<compile_context>
chip_gen: v7x
topology: tpu7x:2x2x1
jax: 0.10.0
libtpu: 0.0.40
codegen_flags: <defaults>
</compile_context>

<pallas_src>
import math
import jax
import jax.numpy as jnp
from jax.experimental import pallas as pl
from jax.experimental.pallas import tpu as pltpu

LN_EPS = 1e-5
GELU_C = math.sqrt(2.0 / math.pi)
VMEM_LIMIT = 32 * 1024 * 1024        # safe scoped-VMEM request on v5e/v6e/v7x

# tile preferences (clamped to full dims for small shapes; chosen so that
# double-buffered tiles + scratch stay well under v7x's 64 MiB physical VMEM
# even at real GPT-2 sizes D=768, d_ff=3072)
TM_PREF = 256      # token (sublane) tile
TN_PREF = 256      # output-feature (lane) tile
TK_PREF = 512      # d_ff reduction tile for the fused MLP


def _pick_tile(dim, pref):
    """pref if it evenly divides dim, else the full dim (keeps (8,128) rule)."""
    return pref if (dim > pref and dim % pref == 0) else dim


def _gelu_new(h):
    # GPT-2 "gelu_new" (tanh approximation), f32 elementwise (VPU/EUP)
    return 0.5 * h * (1.0 + jnp.tanh(GELU_C * (h + 0.044715 * h * h * h)))


def _layernorm(x, g, b):
    mu = jnp.mean(x, axis=-1, keepdims=True)
    var = jnp.mean((x - mu) ** 2, axis=-1, keepdims=True)
    return (x - mu) * jax.lax.rsqrt(var + LN_EPS) * g + b


# ------------------------- kernels -------------------------

def ln_matmul_kernel(x_ref, g_ref, b_ref, w_ref, bias_ref, o_ref):
    """LN prologue (f32) -> bf16 matmul on the MXU -> bias.  Used for qkv."""
    ln = _layernorm(x_ref[...], g_ref[...], b_ref[...])
    y = jnp.dot(ln.astype(jnp.bfloat16), w_ref[...],
                preferred_element_type=jnp.float32) + bias_ref[...]
    o_ref[...] = y.astype(o_ref.dtype)


def matmul_bias_res_kernel(x_ref, w_ref, bias_ref, res_ref, o_ref):
    """bf16 matmul + bias + residual epilogue.  Used for c_proj."""
    y = jnp.dot(x_ref[...], w_ref[...], preferred_element_type=jnp.float32)
    o_ref[...] = (y + bias_ref[...] + res_ref[...]).astype(o_ref.dtype)


def fused_mlp_kernel(x_ref, g_ref, b_ref, wfc_ref, bfc_ref, wpj_ref, bpj_ref,
                     o_ref, acc_ref, ln_ref):
    """LN2 -> fc -> gelu_new -> fproj -> +residual, reduced over d_ff tiles.

    Grid = (M//tm, d_ff//tk); the (N, d_ff) intermediate never hits HBM.
    """
    k = pl.program_id(1)

    @pl.when(k == 0)
    def _():
        ln_ref[...] = _layernorm(x_ref[...], g_ref[...],
                                 b_ref[...]).astype(jnp.bfloat16)
        acc_ref[...] = jnp.zeros_like(acc_ref)

    h = jnp.dot(ln_ref[...], wfc_ref[...],
                preferred_element_type=jnp.float32) + bfc_ref[...]
    h = _gelu_new(h)
    acc_ref[...] += jnp.dot(h.astype(jnp.bfloat16), wpj_ref[...],
                            preferred_element_type=jnp.float32)

    @pl.when(k == pl.num_programs(1) - 1)
    def _():
        o_ref[...] = (acc_ref[...] + bpj_ref[...] + x_ref[...]).astype(o_ref.dtype)


def layernorm_kernel(x_ref, g_ref, b_ref, o_ref):
    o_ref[...] = _layernorm(x_ref[...], g_ref[...], b_ref[...]).astype(o_ref.dtype)


def make_attn_kernel(n_head, d_head, scale):
    """Causal MHA for one batch element; reads the (S, 3D) qkv slab directly
    and writes a lane-dense (S, D) context (heads concatenated)."""
    D = n_head * d_head
    neg = jnp.finfo(jnp.float32).min

    def kernel(qkv_ref, o_ref):
        xq = qkv_ref[0]                                  # (S, 3D) bf16
        S = xq.shape[0]
        row = jax.lax.broadcasted_iota(jnp.int32, (S, S), 0)
        col = jax.lax.broadcasted_iota(jnp.int32, (S, S), 1)
        causal = col <= row                              # hoisted out of head loop
        parts = []
        for h in range(n_head):                          # static unroll, small H
            lo = h * d_head
            qh = xq[:, lo:lo + d_head]
            kh = xq[:, D + lo:D + lo + d_head]
            vh = xq[:, 2 * D + lo:2 * D + lo + d_head]
            # q @ k^T without materializing k.T (contract Dh of both operands)
            s = jax.lax.dot_general(qh, kh, (((1,), (1,)), ((), ())),
                                    preferred_element_type=jnp.float32) * scale
            s = jnp.where(causal, s, neg)
            p = jnp.exp(s - jnp.max(s, axis=-1, keepdims=True))
            inv_l = pl.reciprocal(jnp.sum(p, axis=-1, keepdims=True), approx=True)
            ctx = jnp.dot(p.astype(xq.dtype), vh,
                          preferred_element_type=jnp.float32) * inv_l
            parts.append(ctx)
        o_ref[0] = jnp.concatenate(parts, axis=-1).astype(o_ref.dtype)

    return kernel


# ------------------------- pallas_call wrappers -------------------------

def pallas_ln_matmul(x, g, b, w, bias, out_dtype=jnp.bfloat16):
    """out = LN(x) @ w + bias, tiled over (M, N)."""
    M, K = x.shape
    Dout = w.shape[1]
    tm = _pick_tile(M, TM_PREF)
    tn = _pick_tile(Dout, TN_PREF)
    return pl.pallas_call(
        ln_matmul_kernel,
        out_shape=jax.ShapeDtypeStruct((M, Dout), out_dtype),
        grid=(M // tm, Dout // tn),
        in_specs=[
            pl.BlockSpec((tm, K), lambda i, j: (i, 0)),
            pl.BlockSpec((1, K), lambda i, j: (0, 0)),
            pl.BlockSpec((1, K), lambda i, j: (0, 0)),
            pl.BlockSpec((K, tn), lambda i, j: (0, j)),
            pl.BlockSpec((1, tn), lambda i, j: (0, j)),
        ],
        out_specs=pl.BlockSpec((tm, tn), lambda i, j: (i, j)),
        compiler_params=pltpu.CompilerParams(
            dimension_semantics=("parallel", "parallel"),
            vmem_limit_bytes=VMEM_LIMIT),
    )(x, g.reshape(1, K), b.reshape(1, K), w, bias.reshape(1, Dout))


def pallas_proj_residual(x, w, bias, res):
    """out = x @ w + bias + res, tiled over (M, N)."""
    M, K = x.shape
    Dout = w.shape[1]
    tm = _pick_tile(M, TM_PREF)
    tn = _pick_tile(Dout, TN_PREF)
    return pl.pallas_call(
        matmul_bias_res_kernel,
        out_shape=jax.ShapeDtypeStruct((M, Dout), jnp.float32),
        grid=(M // tm, Dout // tn),
        in_specs=[
            pl.BlockSpec((tm, K), lambda i, j: (i, 0)),
            pl.BlockSpec((K, tn), lambda i, j: (0, j)),
            pl.BlockSpec((1, tn), lambda i, j: (0, j)),
            pl.BlockSpec((tm, tn), lambda i, j: (i, j)),
        ],
        out_specs=pl.BlockSpec((tm, tn), lambda i, j: (i, j)),
        compiler_params=pltpu.CompilerParams(
            dimension_semantics=("parallel", "parallel"),
            vmem_limit_bytes=VMEM_LIMIT),
    )(x, w, bias.reshape(1, Dout), res)


def pallas_fused_mlp(x, g, b, wfc, bfc, wproj, bproj):
    """out = x + (gelu_new(LN(x) @ wfc + bfc) @ wproj + bproj), d_ff-tiled."""
    M, D = x.shape
    Dff = wfc.shape[1]
    tm = _pick_tile(M, TM_PREF)
    tk = _pick_tile(Dff, TK_PREF)
    return pl.pallas_call(
        fused_mlp_kernel,
        out_shape=jax.ShapeDtypeStruct((M, D), jnp.float32),
        grid=(M // tm, Dff // tk),
        in_specs=[
            pl.BlockSpec((tm, D), lambda i, k: (i, 0)),
            pl.BlockSpec((1, D), lambda i, k: (0, 0)),
            pl.BlockSpec((1, D), lambda i, k: (0, 0)),
            pl.BlockSpec((D, tk), lambda i, k: (0, k)),
            pl.BlockSpec((1, tk), lambda i, k: (0, k)),
            pl.BlockSpec((tk, D), lambda i, k: (k, 0)),
            pl.BlockSpec((1, D), lambda i, k: (0, 0)),
        ],
        out_specs=pl.BlockSpec((tm, D), lambda i, k: (i, 0)),
        scratch_shapes=[pltpu.VMEM((tm, D), jnp.float32),    # f32 accumulator
                        pltpu.VMEM((tm, D), jnp.bfloat16)],  # cached LN(x)
        compiler_params=pltpu.CompilerParams(
            dimension_semantics=("parallel", "arbitrary"),
            vmem_limit_bytes=VMEM_LIMIT),
    )(x, g.reshape(1, D), b.reshape(1, D), wfc, bfc.reshape(1, Dff),
      wproj, bproj.reshape(1, D))


def pallas_attention(qkv, n_head):
    """qkv: (B, S, 3D) bf16 -> context (B, S, D) bf16 (heads merged)."""
    B, S, D3 = qkv.shape
    D = D3 // 3
    Dh = D // n_head
    return pl.pallas_call(
        make_attn_kernel(n_head, Dh, 1.0 / math.sqrt(Dh)),
        out_shape=jax.ShapeDtypeStruct((B, S, D), jnp.bfloat16),
        grid=(B,),
        in_specs=[pl.BlockSpec((1, S, D3), lambda bb: (bb, 0, 0))],
        out_specs=pl.BlockSpec((1, S, D), lambda bb: (bb, 0, 0)),
        compiler_params=pltpu.CompilerParams(
            dimension_semantics=("parallel",),
            vmem_limit_bytes=VMEM_LIMIT),
    )(qkv)


def pallas_layernorm(x, g, b):
    M, D = x.shape
    tm = _pick_tile(M, TM_PREF)
    return pl.pallas_call(
        layernorm_kernel,
        out_shape=jax.ShapeDtypeStruct((M, D), jnp.float32),
        grid=(M // tm,),
        in_specs=[pl.BlockSpec((tm, D), lambda i: (i, 0)),
                  pl.BlockSpec((1, D), lambda i: (0, 0)),
                  pl.BlockSpec((1, D), lambda i: (0, 0))],
        out_specs=pl.BlockSpec((tm, D), lambda i: (i, 0)),
        compiler_params=pltpu.CompilerParams(
            dimension_semantics=("parallel",),
            vmem_limit_bytes=VMEM_LIMIT),
    )(x, g.reshape(1, D), b.reshape(1, D))


# ------------------------- parameters & forward -------------------------

def init_params(key, n_layer, d_model, d_ff, max_pos, lora_r):
    keys = jax.random.split(key, 1 + n_layer)
    init = lambda k, shape, dt=jnp.float32: (
        0.02 * jax.random.normal(k, shape)).astype(dt)
    params = {
        'wpe': init(keys[0], (max_pos, d_model)),
        'lnf_g': jnp.ones((d_model,), jnp.float32),
        'lnf_b': jnp.zeros((d_model,), jnp.float32),
        'layers': [],
    }
    for li in range(n_layer):
        ks = jax.random.split(keys[1 + li], 6)
        layer = {
            'ln1_g': jnp.ones((d_model,), jnp.float32),
            'ln1_b': jnp.zeros((d_model,), jnp.float32),
            # c_attn + LoRA kept f32 so the trace-time fold is exact
            'c_attn_w': init(ks[0], (d_model, 3 * d_model)),
            'c_attn_b': jnp.zeros((3 * d_model,), jnp.float32),
            'lora_A': init(ks[1], (d_model, lora_r)),
            # PEFT inits lora_B to zeros -> LoRA branch is numerically zero
            'lora_B': jnp.zeros((lora_r, 3 * d_model), jnp.float32),
            # remaining matmul weights stored bf16 (MXU-native, half the DMA)
            'c_proj_w': init(ks[2], (d_model, d_model), jnp.bfloat16),
            'c_proj_b': jnp.zeros((d_model,), jnp.float32),
            'ln2_g': jnp.ones((d_model,), jnp.float32),
            'ln2_b': jnp.zeros((d_model,), jnp.float32),
            'fc_w': init(ks[3], (d_model, d_ff), jnp.bfloat16),
            'fc_b': jnp.zeros((d_ff,), jnp.float32),
            'fproj_w': init(ks[4], (d_ff, d_model), jnp.bfloat16),
            'fproj_b': jnp.zeros((d_model,), jnp.float32),
        }
        params['layers'].append(layer)
    return params


def pfa_forward(x, params, n_head, lora_scaling):
    """x: inputs_embeds (B, S, D) -> last_hidden_state (B, S, D), f32."""
    B, S, D = x.shape
    N = B * S
    h = (x + params['wpe'][:S][None, :, :]).astype(jnp.float32).reshape(N, D)

    for layer in params['layers']:
        # Fold LoRA into the base weight at trace time (eval); matmuls in the
        # kernel then run on a single bf16 weight.
        # TODO(synk): for training, keep the LoRA branch as separate matmuls.
        w_qkv = (layer['c_attn_w'] +
                 lora_scaling * (layer['lora_A'] @ layer['lora_B'])
                 ).astype(jnp.bfloat16)

        # LN1 + qkv projection (one kernel), bf16 output slab (N, 3D)
        qkv = pallas_ln_matmul(h, layer['ln1_g'], layer['ln1_b'],
                               w_qkv, layer['c_attn_b'])
        # causal MHA straight off the qkv slab, lane-dense (B, S, D) output
        ctx = pallas_attention(qkv.reshape(B, S, 3 * D), n_head)
        # c_proj + residual (one kernel)
        h = pallas_proj_residual(ctx.reshape(N, D), layer['c_proj_w'],
                                 layer['c_proj_b'], h)
        # LN2 + fc + gelu_new + fproj + residual (one kernel, d_ff-reduction)
        h = pallas_fused_mlp(h, layer['ln2_g'], layer['ln2_b'],
                             layer['fc_w'], layer['fc_b'],
                             layer['fproj_w'], layer['fproj_b'])

    out = pallas_layernorm(h, params['lnf_g'], params['lnf_b'])
    return out.reshape(B, S, D)


if __name__ == "__main__":
    # small GPT-2-like config: 6 layers (gpt_layers=6), tiny dims
    # NOTE: at these demo shapes every tile pads to (8,128); perf conclusions
    # should be drawn at real GPT-2 sizes (D=768, d_ff=3072, S>=512).
    B, S, D = 2, 8, 32
    n_head, d_ff, n_layer = 4, 128, 6
    lora_r, lora_alpha = 16, 16          # matches PFA: r=16, alpha=16
    lora_scaling = lora_alpha / lora_r

    key = jax.random.PRNGKey(0)
    kx, kp = jax.random.split(key)
    x = jax.random.normal(kx, (B, S, D), dtype=jnp.float32)   # inputs_embeds
    params = init_params(kp, n_layer, D, d_ff, max_pos=64, lora_r=lora_r)

    fwd = jax.jit(pfa_forward, static_argnums=(2, 3))
    out = jax.block_until_ready(fwd(x, params, n_head, lora_scaling))

    assert out.shape == (B, S, D) and out.dtype == jnp.float32
    assert bool(jnp.all(jnp.isfinite(out)))
    print("KERNEL_OK")
</pallas_src>

<mosaic_0001>
module attributes {stable_mosaic.version = 11 : i64} {
  func.func @ln_matmul_kernel(%arg0: i32, %arg1: i32, %arg2: memref<16x32xf32, #tpu.memory_space<vmem>>, %arg3: memref<1x32xf32, #tpu.memory_space<vmem>>, %arg4: memref<1x32xf32, #tpu.memory_space<vmem>>, %arg5: memref<32x96xbf16, #tpu.memory_space<vmem>>, %arg6: memref<1x96xf32, #tpu.memory_space<vmem>>, %arg7: memref<16x96xbf16, #tpu.memory_space<vmem>>) attributes {dimension_semantics = [#tpu.dimension_semantics<parallel>, #tpu.dimension_semantics<parallel>], iteration_bounds = array<i64: 1, 1>, scalar_prefetch = 0 : i64, scratch_operands = 0 : i64, tpu.core_type = #tpu.core_type<tc>, window_params = [{transform_indices = @transform_0, window_bounds = array<i64: 16, 32>}, {pipeline_mode = #tpu.pipeline_mode<synchronous>, transform_indices = @transform_1, window_bounds = array<i64: 1, 32>}, {pipeline_mode = #tpu.pipeline_mode<synchronous>, transform_indices = @transform_2, window_bounds = array<i64: 1, 32>}, {transform_indices = @transform_3, window_bounds = array<i64: 32, 96>}, {transform_indices = @transform_4, window_bounds = array<i64: 1, 96>}, {transform_indices = @transform_5, window_bounds = array<i64: 16, 96>}]} {
    %c0 = arith.constant 0 : index
    %c0_0 = arith.constant 0 : index
    %0 = vector.load %arg2[%c0, %c0_0] : memref<16x32xf32, #tpu.memory_space<vmem>>, vector<16x32xf32>
    %c0_1 = arith.constant 0 : index
    %c0_2 = arith.constant 0 : index
    %1 = vector.load %arg3[%c0_1, %c0_2] : memref<1x32xf32, #tpu.memory_space<vmem>>, vector<1x32xf32>
    %c0_3 = arith.constant 0 : index
    %c0_4 = arith.constant 0 : index
    %2 = vector.load %arg4[%c0_3, %c0_4] : memref<1x32xf32, #tpu.memory_space<vmem>>, vector<1x32xf32>
    %cst = arith.constant dense<0.000000e+00> : vector<16xf32>
    %3 = vector.multi_reduction <add>, %0, %cst [1] : vector<16x32xf32> to vector<16xf32>
    %4 = vector.shape_cast %3 : vector<16xf32> to vector<16x1xf32>
    %cst_5 = arith.constant 3.200000e+01 : f32
    %5 = vector.broadcast %cst_5 : f32 to vector<16x1xf32>
    %6 = arith.divf %4, %5 : vector<16x1xf32>
    %7 = vector.broadcast %6 : vector<16x1xf32> to vector<16x32xf32>
    %8 = arith.subf %0, %7 : vector<16x32xf32>
    %9 = arith.mulf %8, %8 : vector<16x32xf32>
    %cst_6 = arith.constant dense<0.000000e+00> : vector<16xf32>
    %10 = vector.multi_reduction <add>, %9, %cst_6 [1] : vector<16x32xf32> to vector<16xf32>
    %11 = vector.shape_cast %10 : vector<16xf32> to vector<16x1xf32>
    %cst_7 = arith.constant 3.200000e+01 : f32
    %12 = vector.broadcast %cst_7 : f32 to vector<16x1xf32>
    %13 = arith.divf %11, %12 : vector<16x1xf32>
    %14 = vector.broadcast %6 : vector<16x1xf32> to vector<16x32xf32>
    %15 = arith.subf %0, %14 : vector<16x32xf32>
    %cst_8 = arith.constant 9.99999974E-6 : f32
    %16 = vector.broadcast %cst_8 : f32 to vector<16x1xf32>
    %17 = arith.addf %13, %16 : vector<16x1xf32>
    %18 = math.rsqrt %17 : vector<16x1xf32>
    %19 = vector.broadcast %18 : vector<16x1xf32> to vector<16x32xf32>
    %20 = arith.mulf %15, %19 : vector<16x32xf32>
    %21 = vector.broadcast %1 : vector<1x32xf32> to vector<16x32xf32>
    %22 = arith.mulf %20, %21 : vector<16x32xf32>
    %23 = vector.broadcast %2 : vector<1x32xf32> to vector<16x32xf32>
    %24 = arith.addf %22, %23 : vector<16x32xf32>
    %25 = arith.truncf %24 : vector<16x32xf32> to vector<16x32xbf16>
    %c0_9 = arith.constant 0 : index
    %c0_10 = arith.constant 0 : index
    %26 = vector.load %arg5[%c0_9, %c0_10] : memref<32x96xbf16, #tpu.memory_space<vmem>>, vector<32x96xbf16>
    %cst_11 = arith.constant dense<0.000000e+00> : vector<16x96xf32>
    %27 = tpu.matmul %25, %26, %cst_11 {dimension_numbers = #tpu.dot_dimension_numbers<[1], [0], [0], [1], [0, 0, 1, 1], [], []>} : vector<16x32xbf16>, vector<32x96xbf16>, vector<16x96xf32> -> vector<16x96xf32>
    %c0_12 = arith.constant 0 : index
    %c0_13 = arith.constant 0 : index
    %28 = vector.load %arg6[%c0_12, %c0_13] : memref<1x96xf32, #tpu.memory_space<vmem>>, vector<1x96xf32>
    %29 = vector.broadcast %28 : vector<1x96xf32> to vector<16x96xf32>
    %30 = arith.addf %27, %29 : vector<16x96xf32>
    %31 = arith.truncf %30 : vector<16x96xf32> to vector<16x96xbf16>
    %c0_14 = arith.constant 0 : index
    %c0_15 = arith.constant 0 : index
    %32 = vector.load %arg7[%c0_14, %c0_15] : memref<16x96xbf16, #tpu.memory_space<vmem>>, vector<16x96xbf16>
    tpu.vector_store %arg7[%c0_14, %c0_15], %31 {strides = array<i32>} : memref<16x96xbf16, #tpu.memory_space<vmem>>, vector<16x96xbf16>,
    return
  }
  func.func @transform_0(%arg0: i32, %arg1: i32) -> (i32, i32) {
    %c0_i32 = arith.constant 0 : i32
    %c0_i32_0 = arith.constant 0 : i32
    return %arg0, %c0_i32 : i32, i32
  }
  func.func @transform_1(%arg0: i32, %arg1: i32) -> (i32, i32) {
    %c0_i32 = arith.constant 0 : i32
    %c0_i32_0 = arith.constant 0 : i32
    %c0_i32_1 = arith.constant 0 : i32
    return %c0_i32, %c0_i32_0 : i32, i32
  }
  func.func @transform_2(%arg0: i32, %arg1: i32) -> (i32, i32) {
    %c0_i32 = arith.constant 0 : i32
    %c0_i32_0 = arith.constant 0 : i32
    %c0_i32_1 = arith.constant 0 : i32
    return %c0_i32, %c0_i32_0 : i32, i32
  }
  func.func @transform_3(%arg0: i32, %arg1: i32) -> (i32, i32) {
    %c0_i32 = arith.constant 0 : i32
    %c0_i32_0 = arith.constant 0 : i32
    return %c0_i32, %arg1 : i32, i32
  }
  func.func @transform_4(%arg0: i32, %arg1: i32) -> (i32, i32) {
    %c0_i32 = arith.constant 0 : i32
    %c0_i32_0 = arith.constant 0 : i32
    return %c0_i32, %arg1 : i32, i32
  }
  func.func @transform_5(%arg0: i32, %arg1: i32) -> (i32, i32) {
    %c0_i32 = arith.constant 0 : i32
    return %arg0, %arg1 : i32, i32
  }
}

module attributes {stable_mosaic.version = 11 : i64} {
  func.func @kernel(%arg0: i32, %arg1: memref<1x8x96xbf16, #tpu.memory_space<vmem>>, %arg2: memref<1x8x32xbf16, #tpu.memory_space<vmem>>) attributes {dimension_semantics = [#tpu.dimension_semantics<parallel>], iteration_bounds = array<i64: 2>, scalar_prefetch = 0 : i64, scratch_operands = 0 : i64, tpu.core_type = #tpu.core_type<tc>, window_params = [{transform_indices = @transform_0, window_bounds = array<i64: 1, 8, 96>}, {transform_indices = @transform_1, window_bounds = array<i64: 1, 8, 32>}]} {
    %c0 = arith.constant 0 : index
    %c0_0 = arith.constant 0 : index
    %c0_1 = arith.constant 0 : index
    %0 = vector.load %arg1[%c0, %c0_0, %c0_1] : memref<1x8x96xbf16, #tpu.memory_space<vmem>>, vector<1x8x96xbf16>
    %1 = vector.shape_cast %0 : vector<1x8x96xbf16> to vector<8x96xbf16>
    %2 = tpu.iota {dimensions = array<i32: 0>} : vector<8x8xi32>
    %3 = tpu.iota {dimensions = array<i32: 1>} : vector<8x8xi32>
    %4 = arith.cmpi sle, %3, %2 : vector<8x8xi32>
    %5 = vector.extract_strided_slice %1 {offsets = [0, 0], sizes = [8, 8], strides = [1, 1]} : vector<8x96xbf16> to vector<8x8xbf16>
    %6 = vector.extract_strided_slice %1 {offsets = [0, 32], sizes = [8, 8], strides = [1, 1]} : vector<8x96xbf16> to vector<8x8xbf16>
    %7 = vector.extract_strided_slice %1 {offsets = [0, 64], sizes = [8, 8], strides = [1, 1]} : vector<8x96xbf16> to vector<8x8xbf16>
    %cst = arith.constant dense<0.000000e+00> : vector<8x8xf32>
    %8 = tpu.matmul %5, %6, %cst {dimension_numbers = #tpu.dot_dimension_numbers<[1], [1], [0], [0], [0, 0, 1, 0], [], []>} : vector<8x8xbf16>, vector<8x8xbf16>, vector<8x8xf32> -> vector<8x8xf32>
    %cst_2 = arith.constant 0.353553385 : f32
    %9 = vector.broadcast %cst_2 : f32 to vector<8x8xf32>
    %10 = arith.mulf %8, %9 : vector<8x8xf32>
    %cst_3 = arith.constant -3.40282347E+38 : f32
    %11 = vector.broadcast %cst_3 : f32 to vector<8x8xf32>
    %12 = arith.select %4, %10, %11 : vector<8x8xi1>, vector<8x8xf32>
    %cst_4 = arith.constant dense<0xFF800000> : vector<8xf32>
    %13 = vector.multi_reduction <maximumf>, %12, %cst_4 [1] : vector<8x8xf32> to vector<8xf32>
    %14 = vector.shape_cast %13 : vector<8xf32> to vector<8x1xf32>
    %15 = vector.broadcast %14 : vector<8x1xf32> to vector<8x8xf32>
    %16 = arith.subf %12, %15 : vector<8x8xf32>
    %17 = math.exp %16 : vector<8x8xf32>
    %cst_5 = arith.constant dense<0.000000e+00> : vector<8xf32>
    %18 = vector.multi_reduction <add>, %17, %cst_5 [1] : vector<8x8xf32> to vector<8xf32>
    %19 = vector.shape_cast %18 : vector<8xf32> to vector<8x1xf32>
    %20 = tpu.reciprocal %19 {approx = true} : vector<8x1xf32> -> vector<8x1xf32>
    %21 = arith.truncf %17 : vector<8x8xf32> to vector<8x8xbf16>
    %cst_6 = arith.constant dense<0.000000e+00> : vector<8x8xf32>
    %22 = tpu.matmul %21, %7, %cst_6 {dimension_numbers = #tpu.dot_dimension_numbers<[1], [0], [0], [1], [0, 0, 1, 1], [], []>} : vector<8x8xbf16>, vector<8x8xbf16>, vector<8x8xf32> -> vector<8x8xf32>
    %23 = vector.broadcast %20 : vector<8x1xf32> to vector<8x8xf32>
    %24 = arith.mulf %22, %23 : vector<8x8xf32>
    %25 = vector.extract_strided_slice %1 {offsets = [0, 8], sizes = [8, 8], strides = [1, 1]} : vector<8x96xbf16> to vector<8x8xbf16>
    %26 = vector.extract_strided_slice %1 {offsets = [0, 40], sizes = [8, 8], strides = [1, 1]} : vector<8x96xbf16> to vector<8x8xbf16>
    %27 = vector.extract_strided_slice %1 {offsets = [0, 72], sizes = [8, 8], strides = [1, 1]} : vector<8x96xbf16> to vector<8x8xbf16>
    %cst_7 = arith.constant dense<0.000000e+00> : vector<8x8xf32>
    %28 = tpu.matmul %25, %26, %cst_7 {dimension_numbers = #tpu.dot_dimension_numbers<[1], [1], [0], [0], [0, 0, 1, 0], [], []>} : vector<8x8xbf16>, vector<8x8xbf16>, vector<8x8xf32> -> vector<8x8xf32>
    %cst_8 = arith.constant 0.353553385 : f32
    %29 = vector.broadcast %cst_8 : f32 to vector<8x8xf32>
    %30 = arith.mulf %28, %29 : vector<8x8xf32>
    %cst_9 = arith.constant -3.40282347E+38 : f32
    %31 = vector.broadcast %cst_9 : f32 to vector<8x8xf32>
    %32 = arith.select %4, %30, %31 : vector<8x8xi1>, vector<8x8xf32>
    %cst_10 = arith.constant dense<0xFF800000> : vector<8xf32>
    %33 = vector.multi_reduction <maximumf>, %32, %cst_10 [1] : vector<8x8xf32> to vector<8xf32>
    %34 = vector.shape_cast %33 : vector<8xf32> to vector<8x1xf32>
    %35 = vector.broadcast %34 : vector<8x1xf32> to vector<8x8xf32>
    %36 = arith.subf %32, %35 : vector<8x8xf32>
    %37 = math.exp %36 : vector<8x8xf32>
    %cst_11 = arith.constant dense<0.000000e+00> : vector<8xf32>
    %38 = vector.multi_reduction <add>, %37, %cst_11 [1] : vector<8x8xf32> to vector<8xf32>
    %39 = vector.shape_cast %38 : vector<8xf32> to vector<8x1xf32>
    %40 = tpu.reciprocal %39 {approx = true} : vector<8x1xf32> -> vector<8x1xf32>
    %41 = arith.truncf %37 : vector<8x8xf32> to vector<8x8xbf16>
    %cst_12 = arith.constant dense<0.000000e+00> : vector<8x8xf32>
    %42 = tpu.matmul %41, %27, %cst_12 {dimension_numbers = #tpu.dot_dimension_numbers<[1], [0], [0], [1], [0, 0, 1, 1], [], []>} : vector<8x8xbf16>, vector<8x8xbf16>, vector<8x8xf32> -> vector<8x8xf32>
    %43 = vector.broadcast %40 : vector<8x1xf32> to vector<8x8xf32>
    %44 = arith.mulf %42, %43 : vector<8x8xf32>
    %45 = vector.extract_strided_slice %1 {offsets = [0, 16], sizes = [8, 8], strides = [1, 1]} : vector<8x96xbf16> to vector<8x8xbf16>
    %46 = vector.extract_strided_slice %1 {offsets = [0, 48], sizes = [8, 8], strides = [1, 1]} : vector<8x96xbf16> to vector<8x8xbf16>
    %47 = vector.extract_strided_slice %1 {offsets = [0, 80], sizes = [8, 8], strides = [1, 1]} : vector<8x96xbf16> to vector<8x8xbf16>
    %cst_13 = arith.constant dense<0.000000e+00> : vector<8x8xf32>
    %48 = tpu.matmul %45, %46, %cst_13 {dimension_numbers = #tpu.dot_dimension_numbers<[1], [1], [0], [0], [0, 0, 1, 0], [], []>} : vector<8x8xbf16>, vector<8x8xbf16>, vector<8x8xf32> -> vector<8x8xf32>
    %cst_14 = arith.constant 0.353553385 : f32
    %49 = vector.broadcast %cst_14 : f32 to vector<8x8xf32>
    %50 = arith.mulf %48, %49 : vector<8x8xf32>
    %cst_15 = arith.constant -3.40282347E+38 : f32
    %51 = vector.broadcast %cst_15 : f32 to vector<8x8xf32>
    %52 = arith.select %4, %50, %51 : vector<8x8xi1>, vector<8x8xf32>
    %cst_16 = arith.constant dense<0xFF800000> : vector<8xf32>
    %53 = vector.multi_reduction <maximumf>, %52, %cst_16 [1] : vector<8x8xf32> to vector<8xf32>
    %54 = vector.shape_cast %53 : vector<8xf32> to vector<8x1xf32>
    %55 = vector.broadcast %54 : vector<8x1xf32> to vector<8x8xf32>
    %56 = arith.subf %52, %55 : vector<8x8xf32>
    %57 = math.exp %56 : vector<8x8xf32>
    %cst_17 = arith.constant dense<0.000000e+00> : vector<8xf32>
    %58 = vector.multi_reduction <add>, %57, %cst_17 [1] : vector<8x8xf32> to vector<8xf32>
    %59 = vector.shape_cast %58 : vector<8xf32> to vector<8x1xf32>
    %60 = tpu.reciprocal %59 {approx = true} : vector<8x1xf32> -> vector<8x1xf32>
    %61 = arith.truncf %57 : vector<8x8xf32> to vector<8x8xbf16>
    %cst_18 = arith.constant dense<0.000000e+00> : vector<8x8xf32>
    %62 = tpu.matmul %61, %47, %cst_18 {dimension_numbers = #tpu.dot_dimension_numbers<[1], [0], [0], [1], [0, 0, 1, 1], [], []>} : vector<8x8xbf16>, vector<8x8xbf16>, vector<8x8xf32> -> vector<8x8xf32>
    %63 = vector.broadcast %60 : vector<8x1xf32> to vector<8x8xf32>
    %64 = arith.mulf %62, %63 : vector<8x8xf32>
    %65 = vector.extract_strided_slice %1 {offsets = [0, 24], sizes = [8, 8], strides = [1, 1]} : vector<8x96xbf16> to vector<8x8xbf16>
    %66 = vector.extract_strided_slice %1 {offsets = [0, 56], sizes = [8, 8], strides = [1, 1]} : vector<8x96xbf16> to vector<8x8xbf16>
    %67 = vector.extract_strided_slice %1 {offsets = [0, 88], sizes = [8, 8], strides = [1, 1]} : vector<8x96xbf16> to vector<8x8xbf16>
    %cst_19 = arith.constant dense<0.000000e+00> : vector<8x8xf32>
    %68 = tpu.matmul %65, %66, %cst_19 {dimension_numbers = #tpu.dot_dimension_numbers<[1], [1], [0], [0], [0, 0, 1, 0], [], []>} : vector<8x8xbf16>, vector<8x8xbf16>, vector<8x8xf32> -> vector<8x8xf32>
    %cst_20 = arith.constant 0.353553385 : f32
    %69 = vector.broadcast %cst_20 : f32 to vector<8x8xf32>
    %70 = arith.mulf %68, %69 : vector<8x8xf32>
    %cst_21 = arith.constant -3.40282347E+38 : f32
    %71 = vector.broadcast %cst_21 : f32 to vector<8x8xf32>
    %72 = arith.select %4, %70, %71 : vector<8x8xi1>, vector<8x8xf32>
    %cst_22 = arith.constant dense<0xFF800000> : vector<8xf32>
    %73 = vector.multi_reduction <maximumf>, %72, %cst_22 [1] : vector<8x8xf32> to vector<8xf32>
    %74 = vector.shape_cast %73 : vector<8xf32> to vector<8x1xf32>
    %75 = vector.broadcast %74 : vector<8x1xf32> to vector<8x8xf32>
    %76 = arith.subf %72, %75 : vector<8x8xf32>
    %77 = math.exp %76 : vector<8x8xf32>
    %cst_23 = arith.constant dense<0.000000e+00> : vector<8xf32>
    %78 = vector.multi_reduction <add>, %77, %cst_23 [1] : vector<8x8xf32> to vector<8xf32>
    %79 = vector.shape_cast %78 : vector<8xf32> to vector<8x1xf32>
    %80 = tpu.reciprocal %79 {approx = true} : vector<8x1xf32> -> vector<8x1xf32>
    %81 = arith.truncf %77 : vector<8x8xf32> to vector<8x8xbf16>
    %cst_24 = arith.constant dense<0.000000e+00> : vector<8x8xf32>
    %82 = tpu.matmul %81, %67, %cst_24 {dimension_numbers = #tpu.dot_dimension_numbers<[1], [0], [0], [1], [0, 0, 1, 1], [], []>} : vector<8x8xbf16>, vector<8x8xbf16>, vector<8x8xf32> -> vector<8x8xf32>
    %83 = vector.broadcast %80 : vector<8x1xf32> to vector<8x8xf32>
    %84 = arith.mulf %82, %83 : vector<8x8xf32>
    %85 = tpu.concatenate %24, %44, %64, %84 in 1 : vector<8x8xf32>, vector<8x8xf32>, vector<8x8xf32>, vector<8x8xf32> -> vector<8x32xf32>
    %86 = arith.truncf %85 : vector<8x32xf32> to vector<8x32xbf16>
    %c0_25 = arith.constant 0 : index
    %c0_26 = arith.constant 0 : index
    %c0_27 = arith.constant 0 : index
    %87 = vector.load %arg2[%c0_25, %c0_26, %c0_27] : memref<1x8x32xbf16, #tpu.memory_space<vmem>>, vector<1x8x32xbf16>
    %88 = vector.shape_cast %87 : vector<1x8x32xbf16> to vector<8x32xbf16>
    %89 = vector.shape_cast %86 : vector<8x32xbf16> to vector<1x8x32xbf16>
    tpu.vector_store %arg2[%c0_25, %c0_26, %c0_27], %89 {strides = array<i32>} : memref<1x8x32xbf16, #tpu.memory_space<vmem>>, vector<1x8x32xbf16>,
    return
  }
  func.func @transform_0(%arg0: i32) -> (i32, i32, i32) {
    %c0_i32 = arith.constant 0 : i32
    %c0_i32_0 = arith.constant 0 : i32
    %c0_i32_1 = arith.constant 0 : i32
    return %arg0, %c0_i32, %c0_i32_0 : i32, i32, i32
  }
  func.func @transform_1(%arg0: i32) -> (i32, i32, i32) {
    %c0_i32 = arith.constant 0 : i32
    %c0_i32_0 = arith.constant 0 : i32
    %c0_i32_1 = arith.constant 0 : i32
    return %arg0, %c0_i32, %c0_i32_0 : i32, i32, i32
  }
}

module attributes {stable_mosaic.version = 11 : i64} {
  func.func @matmul_bias_res_kernel(%arg0: i32, %arg1: i32, %arg2: memref<16x32xbf16, #tpu.memory_space<vmem>>, %arg3: memref<32x32xbf16, #tpu.memory_space<vmem>>, %arg4: memref<1x32xf32, #tpu.memory_space<vmem>>, %arg5: memref<16x32xf32, #tpu.memory_space<vmem>>, %arg6: memref<16x32xf32, #tpu.memory_space<vmem>>) attributes {dimension_semantics = [#tpu.dimension_semantics<parallel>, #tpu.dimension_semantics<parallel>], iteration_bounds = array<i64: 1, 1>, scalar_prefetch = 0 : i64, scratch_operands = 0 : i64, tpu.core_type = #tpu.core_type<tc>, window_params = [{transform_indices = @transform_0, window_bounds = array<i64: 16, 32>}, {transform_indices = @transform_1, window_bounds = array<i64: 32, 32>}, {transform_indices = @transform_2, window_bounds = array<i64: 1, 32>}, {transform_indices = @transform_3, window_bounds = array<i64: 16, 32>}, {transform_indices = @transform_4, window_bounds = array<i64: 16, 32>}]} {
    %c0 = arith.constant 0 : index
    %c0_0 = arith.constant 0 : index
    %0 = vector.load %arg2[%c0, %c0_0] : memref<16x32xbf16, #tpu.memory_space<vmem>>, vector<16x32xbf16>
    %c0_1 = arith.constant 0 : index
    %c0_2 = arith.constant 0 : index
    %1 = vector.load %arg3[%c0_1, %c0_2] : memref<32x32xbf16, #tpu.memory_space<vmem>>, vector<32x32xbf16>
    %cst = arith.constant dense<0.000000e+00> : vector<16x32xf32>
    %2 = tpu.matmul %0, %1, %cst {dimension_numbers = #tpu.dot_dimension_numbers<[1], [0], [0], [1], [0, 0, 1, 1], [], []>} : vector<16x32xbf16>, vector<32x32xbf16>, vector<16x32xf32> -> vector<16x32xf32>
    %c0_3 = arith.constant 0 : index
    %c0_4 = arith.constant 0 : index
    %3 = vector.load %arg4[%c0_3, %c0_4] : memref<1x32xf32, #tpu.memory_space<vmem>>, vector<1x32xf32>
    %4 = vector.broadcast %3 : vector<1x32xf32> to vector<16x32xf32>
    %5 = arith.addf %2, %4 : vector<16x32xf32>
    %c0_5 = arith.constant 0 : index
    %c0_6 = arith.constant 0 : index
    %6 = vector.load %arg5[%c0_5, %c0_6] : memref<16x32xf32, #tpu.memory_space<vmem>>, vector<16x32xf32>
    %7 = arith.addf %5, %6 : vector<16x32xf32>
    %c0_7 = arith.constant 0 : index
    %c0_8 = arith.constant 0 : index
    %8 = vector.load %arg6[%c0_7, %c0_8] : memref<16x32xf32, #tpu.memory_space<vmem>>, vector<16x32xf32>
    tpu.vector_store %arg6[%c0_7, %c0_8], %7 {strides = array<i32>} : memref<16x32xf32, #tpu.memory_space<vmem>>, vector<16x32xf32>,
    return
  }
  func.func @transform_0(%arg0: i32, %arg1: i32) -> (i32, i32) {
    %c0_i32 = arith.constant 0 : i32
    %c0_i32_0 = arith.constant 0 : i32
    return %arg0, %c0_i32 : i32, i32
  }
  func.func @transform_1(%arg0: i32, %arg1: i32) -> (i32, i32) {
    %c0_i32 = arith.constant 0 : i32
    %c0_i32_0 = arith.constant 0 : i32
    return %c0_i32, %arg1 : i32, i32
  }
  func.func @transform_2(%arg0: i32, %arg1: i32) -> (i32, i32) {
    %c0_i32 = arith.constant 0 : i32
    %c0_i32_0 = arith.constant 0 : i32
    return %c0_i32, %arg1 : i32, i32
  }
  func.func @transform_3(%arg0: i32, %arg1: i32) -> (i32, i32) {
    %c0_i32 = arith.constant 0 : i32
    return %arg0, %arg1 : i32, i32
  }
  func.func @transform_4(%arg0: i32, %arg1: i32) -> (i32, i32) {
    %c0_i32 = arith.constant 0 : i32
    return %arg0, %arg1 : i32, i32
  }
}

module attributes {stable_mosaic.version = 11 : i64} {
  func.func @fused_mlp_kernel(%arg0: i32, %arg1: i32, %arg2: memref<16x32xf32, #tpu.memory_space<vmem>>, %arg3: memref<1x32xf32, #tpu.memory_space<vmem>>, %arg4: memref<1x32xf32, #tpu.memory_space<vmem>>, %arg5: memref<32x128xbf16, #tpu.memory_space<vmem>>, %arg6: memref<1x128xf32, #tpu.memory_space<vmem>>, %arg7: memref<128x32xbf16, #tpu.memory_space<vmem>>, %arg8: memref<1x32xf32, #tpu.memory_space<vmem>>, %arg9: memref<16x32xf32, #tpu.memory_space<vmem>>, %arg10: memref<16x32xf32, #tpu.memory_space<vmem>>, %arg11: memref<16x32xbf16, #tpu.memory_space<vmem>>) attributes {dimension_semantics = [#tpu.dimension_semantics<parallel>, #tpu.dimension_semantics<arbitrary>], iteration_bounds = array<i64: 1, 1>, scalar_prefetch = 0 : i64, scratch_operands = 2 : i64, tpu.core_type = #tpu.core_type<tc>, window_params = [{transform_indices = @transform_0, window_bounds = array<i64: 16, 32>}, {pipeline_mode = #tpu.pipeline_mode<synchronous>, transform_indices = @transform_1, window_bounds = array<i64: 1, 32>}, {pipeline_mode = #tpu.pipeline_mode<synchronous>, transform_indices = @transform_2, window_bounds = array<i64: 1, 32>}, {transform_indices = @transform_3, window_bounds = array<i64: 32, 128>}, {transform_indices = @transform_4, window_bounds = array<i64: 1, 128>}, {transform_indices = @transform_5, window_bounds = array<i64: 128, 32>}, {pipeline_mode = #tpu.pipeline_mode<synchronous>, transform_indices = @transform_6, window_bounds = array<i64: 1, 32>}, {transform_indices = @transform_7, window_bounds = array<i64: 16, 32>}]} {
    %c0_i32 = arith.constant 0 : i32
    %0 = arith.cmpi eq, %arg1, %c0_i32 : i32
    %1 = arith.extui %0 : i1 to i32
    %c0_i32_0 = arith.constant 0 : i32
    %2 = arith.cmpi ne, %1, %c0_i32_0 : i32
    scf.if %2 {
      %c0_19 = arith.constant 0 : index
      %c0_20 = arith.constant 0 : index
      %31 = vector.load %arg2[%c0_19, %c0_20] : memref<16x32xf32, #tpu.memory_space<vmem>>, vector<16x32xf32>
      %c0_21 = arith.constant 0 : index
      %c0_22 = arith.constant 0 : index
      %32 = vector.load %arg3[%c0_21, %c0_22] : memref<1x32xf32, #tpu.memory_space<vmem>>, vector<1x32xf32>
      %c0_23 = arith.constant 0 : index
      %c0_24 = arith.constant 0 : index
      %33 = vector.load %arg4[%c0_23, %c0_24] : memref<1x32xf32, #tpu.memory_space<vmem>>, vector<1x32xf32>
      %cst_25 = arith.constant dense<0.000000e+00> : vector<16xf32>
      %34 = vector.multi_reduction <add>, %31, %cst_25 [1] : vector<16x32xf32> to vector<16xf32>
      %35 = vector.shape_cast %34 : vector<16xf32> to vector<16x1xf32>
      %cst_26 = arith.constant 3.200000e+01 : f32
      %36 = vector.broadcast %cst_26 : f32 to vector<16x1xf32>
      %37 = arith.divf %35, %36 : vector<16x1xf32>
      %38 = vector.broadcast %37 : vector<16x1xf32> to vector<16x32xf32>
      %39 = arith.subf %31, %38 : vector<16x32xf32>
      %40 = arith.mulf %39, %39 : vector<16x32xf32>
      %cst_27 = arith.constant dense<0.000000e+00> : vector<16xf32>
      %41 = vector.multi_reduction <add>, %40, %cst_27 [1] : vector<16x32xf32> to vector<16xf32>
      %42 = vector.shape_cast %41 : vector<16xf32> to vector<16x1xf32>
      %cst_28 = arith.constant 3.200000e+01 : f32
      %43 = vector.broadcast %cst_28 : f32 to vector<16x1xf32>
      %44 = arith.divf %42, %43 : vector<16x1xf32>
      %45 = vector.broadcast %37 : vector<16x1xf32> to vector<16x32xf32>
      %46 = arith.subf %31, %45 : vector<16x32xf32>
      %cst_29 = arith.constant 9.99999974E-6 : f32
      %47 = vector.broadcast %cst_29 : f32 to vector<16x1xf32>
      %48 = arith.addf %44, %47 : vector<16x1xf32>
      %49 = math.rsqrt %48 : vector<16x1xf32>
      %50 = vector.broadcast %49 : vector<16x1xf32> to vector<16x32xf32>
      %51 = arith.mulf %46, %50 : vector<16x32xf32>
      %52 = vector.broadcast %32 : vector<1x32xf32> to vector<16x32xf32>
      %53 = arith.mulf %51, %52 : vector<16x32xf32>
      %54 = vector.broadcast %33 : vector<1x32xf32> to vector<16x32xf32>
      %55 = arith.addf %53, %54 : vector<16x32xf32>
      %56 = arith.truncf %55 : vector<16x32xf32> to vector<16x32xbf16>
      %c0_30 = arith.constant 0 : index
      %c0_31 = arith.constant 0 : index
      %57 = vector.load %arg11[%c0_30, %c0_31] : memref<16x32xbf16, #tpu.memory_space<vmem>>, vector<16x32xbf16>
      tpu.vector_store %arg11[%c0_30, %c0_31], %56 {strides = array<i32>} : memref<16x32xbf16, #tpu.memory_space<vmem>>, vector<16x32xbf16>,
      %cst_32 = arith.constant 0.000000e+00 : f32
      %58 = vector.broadcast %cst_32 : f32 to vector<16x32xf32>
      %c0_33 = arith.constant 0 : index
      %c0_34 = arith.constant 0 : index
      %59 = vector.load %arg10[%c0_33, %c0_34] : memref<16x32xf32, #tpu.memory_space<vmem>>, vector<16x32xf32>
      tpu.vector_store %arg10[%c0_33, %c0_34], %58 {strides = array<i32>} : memref<16x32xf32, #tpu.memory_space<vmem>>, vector<16x32xf32>,
    } else {
    }
    %c0 = arith.constant 0 : index
    %c0_1 = arith.constant 0 : index
    %3 = vector.load %arg11[%c0, %c0_1] : memref<16x32xbf16, #tpu.memory_space<vmem>>, vector<16x32xbf16>
    %c0_2 = arith.constant 0 : index
    %c0_3 = arith.constant 0 : index
    %4 = vector.load %arg5[%c0_2, %c0_3] : memref<32x128xbf16, #tpu.memory_space<vmem>>, vector<32x128xbf16>
    %cst = arith.constant dense<0.000000e+00> : vector<16x128xf32>
    %5 = tpu.matmul %3, %4, %cst {dimension_numbers = #tpu.dot_dimension_numbers<[1], [0], [0], [1], [0, 0, 1, 1], [], []>} : vector<16x32xbf16>, vector<32x128xbf16>, vector<16x128xf32> -> vector<16x128xf32>
    %c0_4 = arith.constant 0 : index
    %c0_5 = arith.constant 0 : index
    %6 = vector.load %arg6[%c0_4, %c0_5] : memref<1x128xf32, #tpu.memory_space<vmem>>, vector<1x128xf32>
    %7 = vector.broadcast %6 : vector<1x128xf32> to vector<16x128xf32>
    %8 = arith.addf %5, %7 : vector<16x128xf32>
    %cst_6 = arith.constant 5.000000e-01 : f32
    %9 = vector.broadcast %cst_6 : f32 to vector<16x128xf32>
    %10 = arith.mulf %9, %8 : vector<16x128xf32>
    %cst_7 = arith.constant 4.471500e-02 : f32
    %11 = vector.broadcast %cst_7 : f32 to vector<16x128xf32>
    %12 = arith.mulf %11, %8 : vector<16x128xf32>
    %13 = arith.mulf %12, %8 : vector<16x128xf32>
    %14 = arith.mulf %13, %8 : vector<16x128xf32>
    %15 = arith.addf %8, %14 : vector<16x128xf32>
    %cst_8 = arith.constant 0.797884583 : f32
    %16 = vector.broadcast %cst_8 : f32 to vector<16x128xf32>
    %17 = arith.mulf %16, %15 : vector<16x128xf32>
    %18 = math.tanh %17 : vector<16x128xf32>
    %cst_9 = arith.constant 1.000000e+00 : f32
    %19 = vector.broadcast %cst_9 : f32 to vector<16x128xf32>
    %20 = arith.addf %19, %18 : vector<16x128xf32>
    %21 = arith.mulf %10, %20 : vector<16x128xf32>
    %c0_10 = arith.constant 0 : index
    %c0_11 = arith.constant 0 : index
    %22 = vector.load %arg10[%c0_10, %c0_11] : memref<16x32xf32, #tpu.memory_space<vmem>>, vector<16x32xf32>
    %23 = arith.truncf %21 : vector<16x128xf32> to vector<16x128xbf16>
    %c0_12 = arith.constant 0 : index
    %c0_13 = arith.constant 0 : index
    %24 = vector.load %arg7[%c0_12, %c0_13] : memref<128x32xbf16, #tpu.memory_space<vmem>>, vector<128x32xbf16>
    %cst_14 = arith.constant dense<0.000000e+00> : vector<16x32xf32>
    %25 = tpu.matmul %23, %24, %cst_14 {dimension_numbers = #tpu.dot_dimension_numbers<[1], [0], [0], [1], [0, 0, 1, 1], [], []>} : vector<16x128xbf16>, vector<128x32xbf16>, vector<16x32xf32> -> vector<16x32xf32>
    %26 = arith.addf %22, %25 : vector<16x32xf32>
    %c0_15 = arith.constant 0 : index
    %c0_16 = arith.constant 0 : index
    %27 = vector.load %arg10[%c0_15, %c0_16] : memref<16x32xf32, #tpu.memory_space<vmem>>, vector<16x32xf32>
    tpu.vector_store %arg10[%c0_15, %c0_16], %26 {strides = array<i32>} : memref<16x32xf32, #tpu.memory_space<vmem>>, vector<16x32xf32>,
    %c0_i32_17 = arith.constant 0 : i32
    %28 = arith.cmpi eq, %arg1, %c0_i32_17 : i32
    %29 = arith.extui %28 : i1 to i32
    %c0_i32_18 = arith.constant 0 : i32
    %30 = arith.cmpi ne, %29, %c0_i32_18 : i32
    scf.if %30 {
      %c0_19 = arith.constant 0 : index
      %c0_20 = arith.constant 0 : index
      %31 = vector.load %arg10[%c0_19, %c0_20] : memref<16x32xf32, #tpu.memory_space<vmem>>, vector<16x32xf32>
      %c0_21 = arith.constant 0 : index
      %c0_22 = arith.constant 0 : index
      %32 = vector.load %arg8[%c0_21, %c0_22] : memref<1x32xf32, #tpu.memory_space<vmem>>, vector<1x32xf32>
      %33 = vector.broadcast %32 : vector<1x32xf32> to vector<16x32xf32>
      %34 = arith.addf %31, %33 : vector<16x32xf32>
      %c0_23 = arith.constant 0 : index
      %c0_24 = arith.constant 0 : index
      %35 = vector.load %arg2[%c0_23, %c0_24] : memref<16x32xf32, #tpu.memory_space<vmem>>, vector<16x32xf32>
      %36 = arith.addf %34, %35 : vector<16x32xf32>
      %c0_25 = arith.constant 0 : index
      %c0_26 = arith.constant 0 : index
      %37 = vector.load %arg9[%c0_25, %c0_26] : memref<16x32xf32, #tpu.memory_space<vmem>>, vector<16x32xf32>
      tpu.vector_store %arg9[%c0_25, %c0_26], %36 {strides = array<i32>} : memref<16x32xf32, #tpu.memory_space<vmem>>, vector<16x32xf32>,
    } else {
    }
    return
  }
  func.func @transform_0(%arg0: i32, %arg1: i32) -> (i32, i32) {
    %c0_i32 = arith.constant 0 : i32
    %c0_i32_0 = arith.constant 0 : i32
    return %arg0, %c0_i32 : i32, i32
  }
  func.func @transform_1(%arg0: i32, %arg1: i32) -> (i32, i32) {
    %c0_i32 = arith.constant 0 : i32
    %c0_i32_0 = arith.constant 0 : i32
    %c0_i32_1 = arith.constant 0 : i32
    return %c0_i32, %c0_i32_0 : i32, i32
  }
  func.func @transform_2(%arg0: i32, %arg1: i32) -> (i32, i32) {
    %c0_i32 = arith.constant 0 : i32
    %c0_i32_0 = arith.constant 0 : i32
    %c0_i32_1 = arith.constant 0 : i32
    return %c0_i32, %c0_i32_0 : i32, i32
  }
  func.func @transform_3(%arg0: i32, %arg1: i32) -> (i32, i32) {
    %c0_i32 = arith.constant 0 : i32
    %c0_i32_0 = arith.constant 0 : i32
    return %c0_i32, %arg1 : i32, i32
  }
  func.func @transform_4(%arg0: i32, %arg1: i32) -> (i32, i32) {
    %c0_i32 = arith.constant 0 : i32
    %c0_i32_0 = arith.constant 0 : i32
    return %c0_i32, %arg1 : i32, i32
  }
  func.func @transform_5(%arg0: i32, %arg1: i32) -> (i32, i32) {
    %c0_i32 = arith.constant 0 : i32
    %c0_i32_0 = arith.constant 0 : i32
    return %arg1, %c0_i32 : i32, i32
  }
  func.func @transform_6(%arg0: i32, %arg1: i32) -> (i32, i32) {
    %c0_i32 = arith.constant 0 : i32
    %c0_i32_0 = arith.constant 0 : i32
    %c0_i32_1 = arith.constant 0 : i32
    return %c0_i32, %c0_i32_0 : i32, i32
  }
  func.func @transform_7(%arg0: i32, %arg1: i32) -> (i32, i32) {
    %c0_i32 = arith.constant 0 : i32
    %c0_i32_0 = arith.constant 0 : i32
    return %arg0, %c0_i32 : i32, i32
  }
}

module attributes {stable_mosaic.version = 11 : i64} {
  func.func @layernorm_kernel(%arg0: i32, %arg1: memref<16x32xf32, #tpu.memory_space<vmem>>, %arg2: memref<1x32xf32, #tpu.memory_space<vmem>>, %arg3: memref<1x32xf32, #tpu.memory_space<vmem>>, %arg4: memref<16x32xf32, #tpu.memory_space<vmem>>) attributes {dimension_semantics = [#tpu.dimension_semantics<parallel>], iteration_bounds = array<i64: 1>, scalar_prefetch = 0 : i64, scratch_operands = 0 : i64, tpu.core_type = #tpu.core_type<tc>, window_params = [{transform_indices = @transform_0, window_bounds = array<i64: 16, 32>}, {pipeline_mode = #tpu.pipeline_mode<synchronous>, transform_indices = @transform_1, window_bounds = array<i64: 1, 32>}, {pipeline_mode = #tpu.pipeline_mode<synchronous>, transform_indices = @transform_2, window_bounds = array<i64: 1, 32>}, {transform_indices = @transform_3, window_bounds = array<i64: 16, 32>}]} {
    %c0 = arith.constant 0 : index
    %c0_0 = arith.constant 0 : index
    %0 = vector.load %arg1[%c0, %c0_0] : memref<16x32xf32, #tpu.memory_space<vmem>>, vector<16x32xf32>
    %c0_1 = arith.constant 0 : index
    %c0_2 = arith.constant 0 : index
    %1 = vector.load %arg2[%c0_1, %c0_2] : memref<1x32xf32, #tpu.memory_space<vmem>>, vector<1x32xf32>
    %c0_3 = arith.constant 0 : index
    %c0_4 = arith.constant 0 : index
    %2 = vector.load %arg3[%c0_3, %c0_4] : memref<1x32xf32, #tpu.memory_space<vmem>>, vector<1x32xf32>
    %cst = arith.constant dense<0.000000e+00> : vector<16xf32>
    %3 = vector.multi_reduction <add>, %0, %cst [1] : vector<16x32xf32> to vector<16xf32>
    %4 = vector.shape_cast %3 : vector<16xf32> to vector<16x1xf32>
    %cst_5 = arith.constant 3.200000e+01 : f32
    %5 = vector.broadcast %cst_5 : f32 to vector<16x1xf32>
    %6 = arith.divf %4, %5 : vector<16x1xf32>
    %7 = vector.broadcast %6 : vector<16x1xf32> to vector<16x32xf32>
    %8 = arith.subf %0, %7 : vector<16x32xf32>
    %9 = arith.mulf %8, %8 : vector<16x32xf32>
    %cst_6 = arith.constant dense<0.000000e+00> : vector<16xf32>
    %10 = vector.multi_reduction <add>, %9, %cst_6 [1] : vector<16x32xf32> to vector<16xf32>
    %11 = vector.shape_cast %10 : vector<16xf32> to vector<16x1xf32>
    %cst_7 = arith.constant 3.200000e+01 : f32
    %12 = vector.broadcast %cst_7 : f32 to vector<16x1xf32>
    %13 = arith.divf %11, %12 : vector<16x1xf32>
    %14 = vector.broadcast %6 : vector<16x1xf32> to vector<16x32xf32>
    %15 = arith.subf %0, %14 : vector<16x32xf32>
    %cst_8 = arith.constant 9.99999974E-6 : f32
    %16 = vector.broadcast %cst_8 : f32 to vector<16x1xf32>
    %17 = arith.addf %13, %16 : vector<16x1xf32>
    %18 = math.rsqrt %17 : vector<16x1xf32>
    %19 = vector.broadcast %18 : vector<16x1xf32> to vector<16x32xf32>
    %20 = arith.mulf %15, %19 : vector<16x32xf32>
    %21 = vector.broadcast %1 : vector<1x32xf32> to vector<16x32xf32>
    %22 = arith.mulf %20, %21 : vector<16x32xf32>
    %23 = vector.broadcast %2 : vector<1x32xf32> to vector<16x32xf32>
    %24 = arith.addf %22, %23 : vector<16x32xf32>
    %c0_9 = arith.constant 0 : index
    %c0_10 = arith.constant 0 : index
    %25 = vector.load %arg4[%c0_9, %c0_10] : memref<16x32xf32, #tpu.memory_space<vmem>>, vector<16x32xf32>
    tpu.vector_store %arg4[%c0_9, %c0_10], %24 {strides = array<i32>} : memref<16x32xf32, #tpu.memory_space<vmem>>, vector<16x32xf32>,
    return
  }
  func.func @transform_0(%arg0: i32) -> (i32, i32) {
    %c0_i32 = arith.constant 0 : i32
    %c0_i32_0 = arith.constant 0 : i32
    return %arg0, %c0_i32 : i32, i32
  }
  func.func @transform_1(%arg0: i32) -> (i32, i32) {
    %c0_i32 = arith.constant 0 : i32
    %c0_i32_0 = arith.constant 0 : i32
    %c0_i32_1 = arith.constant 0 : i32
    return %c0_i32, %c0_i32_0 : i32, i32
  }
  func.func @transform_2(%arg0: i32) -> (i32, i32) {
    %c0_i32 = arith.constant 0 : i32
    %c0_i32_0 = arith.constant 0 : i32
    %c0_i32_1 = arith.constant 0 : i32
    return %c0_i32, %c0_i32_0 : i32, i32
  }
  func.func @transform_3(%arg0: i32) -> (i32, i32) {
    %c0_i32 = arith.constant 0 : i32
    %c0_i32_0 = arith.constant 0 : i32
    return %arg0, %c0_i32 : i32, i32
  }
}

</mosaic_0001>

<bundles_post_ra>
// kernel: pfa_forward.25
= control target key start
LH: loop header
LB: loop body
LE: loop exit
PB: predicated region body
PF: predicated region fallthrough
CT: control target
= control target key end

     0   :  { %vm25_vm0 = vcmask 261120   ;;  %v181_v15 = vmov 0.0   ;;  %vm182_vm1 = vmmov 0   ;;  %vm145_vm2 = vcmask 781312   ;;  %s245_s0 = inlined_call_operand.vmem [shape: f32[16,32], index: 0, kind: input, shape index: {}]   ;;  %s246_s3 = inlined_call_operand.vmem [shape: bf16[32,96], index: 3, kind: input, shape index: {}]   ;;  %s247_s1 = inlined_call_operand.vmem [shape: f32[1,32], index: 1, kind: input, shape index: {}]   ;;  %s248_s2 = inlined_call_operand.vmem [shape: f32[1,32], index: 2, kind: input, shape index: {}]   ;;  %s249_s4 = inlined_call_operand.vmem [shape: f32[1,96], index: 4, kind: input, shape index: {}]   ;;  %s250_s5 = inlined_call_operand.vmem [shape: bf16[16,96], index: 5, kind: output, shape index: {}]  }
   0x1   :  { %v21_v0 = vld [vmem:[%s245_s0] sm:$0xff]  ;;  %v22_v1 = vld [vmem:[%s245_s0 + $0x8] sm:$0xff]  ;;  %165 = vmatprep.subr.bf16.mxu0 %v181_v15  ;;  %169 = vmatprep.mubr.msk.bf16.mxu0 %vm182_vm1, %v181_v15 }
   0x2   :  { %v26_v2 = vsel %vm25_vm0, %v21_v0, 0.0  ;;  %v29_v3 = vsel %vm25_vm0, %v22_v1, 0.0  ;;  %v175_v14 = vld [vmem:[%s246_s3] sm:$0xff]   ;;  %v176_v16 = vld [vmem:[%s246_s3 + $0x8] sm:$0xff]  }
   0x3   :  { %27 = vadd.xlane.f32.xlu0 %v26_v2  ;;  %166 = vmatpush3.bf16.msra.mxu0 %v175_v14  ;;  %v152_v25 = vld [vmem:[%s247_s1] ss:$0 sm:$0xff] }
   0x4   :  { %167 = vmatprep.subr.bf16.mxu0 %v181_v15  ;;  %v153_v29 = vld [vmem:[%s248_s2] ss:$0 sm:$0xff] }
   0x5   :  { %v154_v34 = vld [vmem:[%s249_s4] ss:$0 sm:$0xff] }
   0x7   :  { %30 = vadd.xlane.f32.xlu0 %v29_v3  ;;  %168 = vmatpush3.bf16.msra.mxu0 %v176_v16 }
  0x90   :  { %v28_v4 = vpop.xlane.xlu0 %27 }
  0x91   :  { %v33_v5 = vmul.f32 0.03125, %v28_v4 }
  0x93   :  { %v35_v6 = vsub.f32 %v21_v0, %v33_v5 }
  0x94   :  { %v31_v7 = vpop.xlane.xlu0 %30 }
  0x95   :  { %v34_v8 = vmul.f32 0.03125, %v31_v7  ;;  %v37_v9 = vmul.f32 %v35_v6, %v35_v6 }
  0x97   :  { %v36_v10 = vsub.f32 %v22_v1, %v34_v8  ;;  %v39_v11 = vsel %vm25_vm0, %v37_v9, 0.0 }
  0x98   :  { %40 = vadd.xlane.f32.xlu1 %v39_v11 }
  0x99   :  { %v38_v12 = vmul.f32 %v36_v10, %v36_v10 }
  0x9b   :  { %v42_v13 = vsel %vm25_vm0, %v38_v12, 0.0 }
  0x9c   :  { %43 = vadd.xlane.f32.xlu1 %v42_v13 }
 0x125   :  { %v41_v17 = vpop.xlane.xlu1 %40 }
 0x126   :  { %v45_v18 = vmul.f32 0.03125, %v41_v17 }
 0x128   :  { %v47_v19 = vadd.f32 1e-05, %v45_v18 }
 0x129   :  { %v44_v20 = vpop.xlane.xlu1 %43 }
 0x12a   :  { %177 = vrsqrt.f32 %v47_v19  ;;  %v46_v21 = vmul.f32 0.03125, %v44_v20 }
 0x12c   :  { %v48_v22 = vadd.f32 1e-05, %v46_v21 }
 0x12e   :  { %179 = vrsqrt.f32 %v48_v22 }
 0x134   :  { %v178_v23 = vpop.eup %177 }
 0x135   :  { %v51_v24 = vmul.f32 %v178_v23, %v35_v6 }
 0x137   :  { %v59_v28 = vmul.f32 %v152_v25, %v51_v24 }
 0x138   :  { %v180_v26 = vpop.eup %179 }
 0x139   :  { %v52_v27 = vmul.f32 %v180_v26, %v36_v10  ;;  %v67_v31 = vadd.f32 %v153_v29, %v59_v28 }
 0x13b   :  { %v60_v30 = vmul.f32 %v152_v25, %v52_v27 }
 0x13d   :  { %v68_v32 = vadd.f32 %v153_v29, %v60_v30 }
 0x13f   :  { %v69_v33 = vpack.c.bf16 %v68_v32, %v67_v31 }
 0x141   :  { %170 = vmatmul.mubr.msk.bf16.vlgmr.msra.gmra.mrb[0].mxu0 %vm25_vm0, %v69_v33 }
 0x214   :  { %v130_v35 = vpop.f32.mrb[0].mxu0 }
 0x215   :  { %v131_v36 = vadd.f32 %v154_v34, %v130_v35  ;;  %v171_v37 = vpop.f32.mrb[1].mxu0 }
 0x216   :  { %v133_v38 = vpop.f32.mrb[2].mxu0 }
 0x217   :  { %v160_v39 = vpack.c.bf16 %v131_v36, %v131_v36  ;;  %v134_v40 = vadd.f32 %v154_v34, %v133_v38  ;;  %v172_v41 = vpop.f32.mrb[3].mxu0 }
 0x219   :  { %146 = vst.msk [vmem:[%s250_s5] sm:$0xf] %vm145_vm2, %v160_v39  ;;  %v161_v42 = vpack.c.bf16 %v134_v40, %v134_v40 }
 0x21b   :  { %147 = vst.msk [vmem:[%s250_s5 + $0x4] sm:$0xf] %vm145_vm2, %v161_v42 }

// kernel: pfa_forward.26
= control target key start
LH: loop header
LB: loop body
LE: loop exit
PB: predicated region body
PF: predicated region fallthrough
CT: control target
= control target key end

     0   :  { %s800_s6 = smov 0   ;;  %s912_s0 = inlined_call_operand.vmem [shape: bf16[2,8,96], index: 0, kind: input, shape index: {}]   ;;  %s913_s1 = inlined_call_operand.vmem [shape: bf16[2,8,32], index: 1, kind: output, shape index: {}]  }
   0x1 LB: > { %s643_s7 = sadd.s32 4294967295, %s772_s6   ;;  %p647_p0 = scmp.ge.s32.totalorder %s772_s6, 1  ;;  %s772_s6 = sphi %s800_s6, %s11_s6  }
   0x2   : > { %p86_p1 = scmp.lt.s32.totalorder %s772_s6, 3 }
   0x4   : > { %p87_p2 = pnand %p647_p0, %p86_p1 }
   0x5   : > { %p104_p3 = scmp.lt.s32.totalorder (!%p87_p2), %s643_s7, 1  ;;  %v774_v0 = vmov (!%p87_p2), 0.0   ;;  %vm775_vm0 = vmmov (!%p87_p2), 0   ;;  %s776_s12 = smov (!%p87_p2), 96   ;;  %vm124_vm1 = vcmask (!%p87_p2), 64512   ;;  %v114_v5 = vlaneseq (!%p87_p2) }
   0x6   : > { %90 = sbr.rel (%p87_p2) target bundleno = 1249 (0x4e1), region = 24  ;;  %677 = vmatprep.subr.bf16.mxu0 (!%p87_p2), %v774_v0  ;;  %679 = vmatprep.mubr.msk.bf16.mxu0 (!%p87_p2), %vm775_vm0, %v774_v0  ;;  %s777_s13 = smov (!%p87_p2), 64   ;;  %vm189_vm3 = vcmask (!%p87_p2), 1043456   ;;  %vm583_vm4 = vcmask (!%p87_p2), 130048   ;;  %vm585_vm5 = vcmask (!%p87_p2), 195584   ;;  %vm588_vm6 = vcmask (!%p87_p2), 257024  }
   0x7   : > { %683 = vmatprep.subr.bf16.mxu1 (!%p87_p2), %v774_v0  ;;  %685 = vmatprep.mubr.msk.bf16.mxu1 (!%p87_p2), %vm775_vm0, %v774_v0  ;;  %s778_s14 = smov (!%p87_p2), 88   ;;  %s779_s15 = smov (!%p87_p2), 120   ;;  %v837_v6 = vshrl.u32 (!%p87_p2), %v114_v5, 7  ;;  %v839_v7 = vand.u32 (!%p87_p2), 127, %v114_v5 }
   0x8   : > { %s780_s16 = smov (!%p87_p2), 80   ;;  %s781_s17 = smov (!%p87_p2), 112  }
   0x9   : > { %s782_s18 = smov (!%p87_p2), 72   ;;  %s783_s19 = smov (!%p87_p2), 104   ;;  %vm118_vm2 = vcmp.le.s32.totalorder (!%p87_p2), %v839_v7, %v837_v6 }
   0xa   : > { %s784_s20 = smov (!%p87_p2), 56   ;;  %s785_s21 = smov (!%p87_p2), 48  }
   0xb   : > { %s786_s22 = smov (!%p87_p2), 40   ;;  %s787_s23 = smov (!%p87_p2), 8  }
   0xc   : > { %s788_s24 = smov (!%p87_p2), 16   ;;  %s789_s25 = smov (!%p87_p2), 24  }
   0xd   : > { %s915_s7 = smov (!%p104_p3, %s643_s7), 1 }
   0xe   : > { %s648_s8 = sshll.u32 %s915_s7, 2 }
   0xf   : > { %s107_s11 = scalar_lea.vmem %s912_s0, %s648_s8  ;;  %s111_s28 = scalar_lea.vmem %s913_s1, %s648_s8 }
  0x10   : > { %v113_v1 = vld [vmem:[%s107_s11] sm:$0xf] }
  0x11   : > { %v822_v2 = vcombine.low %v113_v1, %v113_v1 }
  0x13   : > { %122 = vrot.lane.b32.xlu0 %v822_v2, %s776_s12  ;;  %184 = vrot.lane.b32.xlu1 %v822_v2, %s777_s13 }
  0x17   : > { %236 = vrot.lane.b32.xlu1 %v822_v2, %s778_s14 }
  0x1b   : > { %234 = vrot.lane.b32.xlu1 %v822_v2, %s779_s15 }
  0x1f   : > { %348 = vrot.lane.b32.xlu1 %v822_v2, %s780_s16 }
  0x23   : > { %346 = vrot.lane.b32.xlu1 %v822_v2, %s781_s17 }
  0x27   : > { %460 = vrot.lane.b32.xlu1 %v822_v2, %s782_s18 }
  0x2b   : > { %458 = vrot.lane.b32.xlu1 %v822_v2, %s783_s19 }
  0x85   : > { %v123_v3 = vpop.permute.xlu0 %122  ;;  %v185_v15 = vpop.permute.xlu1 %184 }
  0x86   : > { %v129_v4 = vsel %vm124_vm1, %v123_v3, 0  ;;  %v191_v16 = vsel %vm189_vm3, %v185_v15, 0 }
  0x87   : > { %678 = vmatpush3.bf16.xpose.msra.mxu0 %v129_v4  ;;  %684 = vmatpush3.bf16.msra.mxu1 %v191_v16 }
  0x88   : > { %695 = vmatprep.subr.bf16.mxu0 %v774_v0  ;;  %689 = vmatprep.subr.bf16.mxu1 %v774_v0 }
  0x89   : > { %v237_v20 = vpop.permute.xlu1 %236 }
  0x8a   : > { %v242_v23 = vsel %vm124_vm1, %v237_v20, 0 }
  0x8d   : > { %v235_v21 = vpop.permute.xlu1 %234 }
  0x8e   : > { %680 = vmatmul.mubr.msk.bf16.vlgmr.msra.gmra.mrb[0].mxu0 %vm124_vm1, %v113_v1 }
  0x8f   : > { %697 = vmatprep.mubr.msk.bf16.mxu0 %vm775_vm0, %v774_v0 }
  0x91   : > { %v349_v25 = vpop.permute.xlu1 %348 }
  0x92   : > { %v354_v27 = vsel %vm124_vm1, %v349_v25, 0 }
  0x95   : > { %v347_v26 = vpop.permute.xlu1 %346 }
  0x99   : > { %v461_v28 = vpop.permute.xlu1 %460 }
  0x9a   : > { %v466_v29 = vsel %vm124_vm1, %v461_v28, 0 }
  0x9d   : > { %v459_v30 = vpop.permute.xlu1 %458 }
 0x161   : > { %v165_v8 = vpop.f32.mrb[0].mxu0 }
 0x162   : > { %v171_v9 = vmul.f32 0.35355338, %v165_v8  ;;  %v681_v10 = vpop.f32.mrb[1].mxu0 }
 0x163   : > { %v168_v11 = vpop.f32.mrb[2].mxu0 }
 0x164   : > { %v682_v12 = vpop.f32.mrb[3].mxu0  ;;  %v172_v13 = vsel %vm118_vm2, %v171_v9, -3.4028235e+38 }
 0x165   : > { %v173_v14 = vsel %vm124_vm1, %v172_v13, -inf }
 0x166   : > { %174 = vmax.xlane.f32.xlu0 %v173_v14 }
 0x17c   : > { %297 = vrot.lane.b32.xlu0 %v822_v2, %s784_s20 }
 0x1f3   : > { %v175_v17 = vpop.xlane.xlu0 %174 }
 0x1f4   : > { %v176_v18 = vsub.f32 %v172_v13, %v175_v17 }
 0x1f6   : > { %v177_v19 = vmul.f32 1.442695, %v176_v18 }
 0x1f7   : > { %v298_v31 = vpop.permute.xlu0 %297 }
 0x1f8   : > { %750 = vpow2.f32 %v177_v19  ;;  %v303_v32 = vsel %vm189_vm3, %v298_v31, 0 }
 0x1f9   : > { %696 = vmatpush3.bf16.msra.mxu0 %v303_v32 }
 0x1fa   : > { %707 = vmatprep.subr.bf16.mxu0 %v774_v0 }
 0x202   : > { %v850_v22 = vpop.eup %750 }
 0x203   : > { %v183_v24 = vpack.c.bf16 %v850_v22, %v850_v22  ;;  %v179_v17 = vsel %vm124_vm1, %v850_v22, 0.0 }
 0x205   : > { %686 = vmatmul.mubr.msk.bf16.vlgmr.msra.gmra.mrb[0].mxu1 %vm124_vm1, %v183_v24 }
 0x206   : > { %690 = vmatpush3.bf16.xpose.msra.mxu1 %v242_v23  ;;  %691 = vmatprep.mubr.msk.bf16.mxu1 %vm775_vm0, %v774_v0 }
 0x207   : > { %701 = vmatprep.subr.bf16.mxu1 %v774_v0 }
 0x20d   : > { %692 = vmatmul.mubr.msk.bf16.vlgmr.msra.gmra.mrb[4].mxu1 %vm124_vm1, %v235_v21 }
 0x20e   : > { %702 = vmatpush3.bf16.xpose.msra.mxu1 %v354_v27  ;;  %703 = vmatprep.mubr.msk.bf16.mxu1 %vm775_vm0, %v774_v0 }
 0x20f   : > { %713 = vmatprep.subr.bf16.mxu1 %v774_v0 }
 0x215   : > { %704 = vmatmul.mubr.msk.bf16.vlgmr.msra.gmra.mrb[8].mxu1 %vm124_vm1, %v347_v26 }
 0x216   : > { %714 = vmatpush3.bf16.xpose.msra.mxu1 %v466_v29  ;;  %715 = vmatprep.mubr.msk.bf16.mxu1 %vm775_vm0, %v774_v0 }
 0x21d   : > { %716 = vmatmul.mubr.msk.bf16.vlgmr.msra.gmra.mrb[12].mxu1 %vm124_vm1, %v459_v30 }
 0x2d8   : > { %v871_v33 = vpop.f32.mrb[0].mxu1 }
 0x2d9   : > { %v687_v34 = vpop.f32.mrb[1].mxu1 }
 0x2da   : > { %v230_v35 = vpop.f32.mrb[2].mxu1 }
 0x2db   : > { %v688_v36 = vpop.f32.mrb[3].mxu1 }
 0x2e0   : > { %v278_v37 = vpop.f32.mrb[4].mxu1 }
 0x2e1   : > { %v284_v38 = vmul.f32 0.35355338, %v278_v37  ;;  %v693_v39 = vpop.f32.mrb[5].mxu1 }
 0x2e2   : > { %v281_v40 = vpop.f32.mrb[6].mxu1 }
 0x2e3   : > { %v694_v41 = vpop.f32.mrb[7].mxu1  ;;  %v285_v42 = vsel %vm118_vm2, %v284_v38, -3.4028235e+38 }
 0x2e4   : > { %v286_v43 = vsel %vm124_vm1, %v285_v42, -inf }
 0x2e5   : > { %287 = vmax.xlane.f32.xlu1 %v286_v43 }
 0x2e8   : > { %v390_v44 = vpop.f32.mrb[8].mxu1 }
 0x2e9   : > { %v396_v45 = vmul.f32 0.35355338, %v390_v44  ;;  %v705_v46 = vpop.f32.mrb[9].mxu1 }
 0x2ea   : > { %v393_v47 = vpop.f32.mrb[10].mxu1 }
 0x2eb   : > { %v706_v48 = vpop.f32.mrb[11].mxu1  ;;  %v397_v49 = vsel %vm118_vm2, %v396_v45, -3.4028235e+38 }
 0x2ec   : > { %v398_v50 = vsel %vm124_vm1, %v397_v49, -inf }
 0x2ed   : > { %399 = vmax.xlane.f32.xlu0 %v398_v50 }
 0x2f0   : > { %v502_v51 = vpop.f32.mrb[12].mxu1 }
 0x2f1   : > { %v508_v52 = vmul.f32 0.35355338, %v502_v51  ;;  %v717_v53 = vpop.f32.mrb[13].mxu1 }
 0x2f2   : > { %v505_v54 = vpop.f32.mrb[14].mxu1 }
 0x2f3   : > { %v718_v55 = vpop.f32.mrb[15].mxu1  ;;  %v509_v56 = vsel %vm118_vm2, %v508_v52, -3.4028235e+38 }
 0x2f4   : > { %v510_v57 = vsel %vm124_vm1, %v509_v56, -inf }
 0x2f5   : > { %511 = vmax.xlane.f32.xlu0 %v510_v57 }
 0x2f6   : > { %409 = vrot.lane.b32.xlu1 %v822_v2, %s785_s21 }
 0x30b   : > { %521 = vrot.lane.b32.xlu0 %v822_v2, %s786_s22 }
 0x372   : > { %v288_v58 = vpop.xlane.xlu1 %287 }
 0x373   : > { %v289_v59 = vsub.f32 %v285_v42, %v288_v58 }
 0x375   : > { %v290_v60 = vmul.f32 1.442695, %v289_v59 }
 0x376   : > { %v410_v1 = vpop.permute.xlu1 %409 }
 0x377   : > { %752 = vpow2.f32 %v290_v60  ;;  %v415_v4 = vsel %vm189_vm3, %v410_v1, 0 }
 0x37a   : > { %v400_v61 = vpop.xlane.xlu0 %399 }
 0x37b   : > { %v401_v62 = vsub.f32 %v397_v49, %v400_v61 }
 0x37d   : > { %v402_v63 = vmul.f32 1.442695, %v401_v62 }
 0x37f   : > { %754 = vpow2.f32 %v402_v63 }
 0x381   : > { %v753_v3 = vpop.eup %752 }
 0x382   : > { %v512_v5 = vpop.xlane.xlu0 %511  ;;  %v292_v6 = vsel %vm124_vm1, %v753_v3, 0.0  ;;  %v296_v7 = vpack.c.bf16 %v753_v3, %v753_v3 }
 0x383   : > { %v513_v8 = vsub.f32 %v509_v56, %v512_v5  ;;  %293 = vadd.xlane.f32.xlu0 %v292_v6 }
 0x384   : > { %698 = vmatmul.mubr.msk.bf16.vlgmr.msra.gmra.mrb[4].mxu0 %vm124_vm1, %v296_v7 }
 0x385   : > { %v514_v2 = vmul.f32 1.442695, %v513_v8  ;;  %708 = vmatpush3.bf16.msra.mxu0 %v415_v4  ;;  %709 = vmatprep.mubr.msk.bf16.mxu0 %vm775_vm0, %v774_v0 }
 0x386   : > { %719 = vmatprep.subr.bf16.mxu0 %v774_v0  ;;  %v522_v9 = vpop.permute.xlu0 %521 }
 0x387   : > { %756 = vpow2.f32 %v514_v2  ;;  %v527_v11 = vsel %vm189_vm3, %v522_v9, 0 }
 0x389   : > { %v755_v10 = vpop.eup %754 }
 0x38a   : > { %v404_v12 = vsel %vm124_vm1, %v755_v10, 0.0  ;;  %v408_v13 = vpack.c.bf16 %v755_v10, %v755_v10 }
 0x38b   : > { %405 = vadd.xlane.f32.xlu1 %v404_v12 }
 0x38c   : > { %710 = vmatmul.mubr.msk.bf16.vlgmr.msra.gmra.mrb[8].mxu0 %vm124_vm1, %v408_v13 }
 0x38d   : > { %720 = vmatpush3.bf16.msra.mxu0 %v527_v11  ;;  %721 = vmatprep.mubr.msk.bf16.mxu0 %vm775_vm0, %v774_v0 }
 0x391   : > { %v757_v14 = vpop.eup %756 }
 0x392   : > { %v516_v15 = vsel %vm124_vm1, %v757_v14, 0.0  ;;  %v520_v16 = vpack.c.bf16 %v757_v14, %v757_v14 }
 0x393   : > { %517 = vadd.xlane.f32.xlu0 %v516_v15 }
 0x394   : > { %722 = vmatmul.mubr.msk.bf16.vlgmr.msra.gmra.mrb[12].mxu0 %vm124_vm1, %v520_v16 }
 0x397   : > { %180 = vadd.xlane.f32.xlu0 %v179_v17 }
 0x410   : > { %v294_v18 = vpop.xlane.xlu0 %293 }
 0x411   : > { %758 = vrcp.f32 %v294_v18 }
 0x418   : > { %v406_v19 = vpop.xlane.xlu1 %405 }
 0x419   : > { %760 = vrcp.f32 %v406_v19 }
 0x41b   : > { %v759_v20 = vpop.eup %758 }
 0x420   : > { %v518_v25 = vpop.xlane.xlu0 %517 }
 0x421   : > { %762 = vrcp.f32 %v518_v25 }
 0x423   : > { %v761_v27 = vpop.eup %760 }
 0x424   : > { %v181_v39 = vpop.xlane.xlu0 %180 }
 0x425   : > { %764 = vrcp.f32 %v181_v39 }
 0x42b   : > { %v763_v32 = vpop.eup %762 }
 0x42f   : > { %v765_v40 = vpop.eup %764 }
 0x430   : > { %v233_v42 = vmul.f32 %v765_v40, %v871_v33 }
 0x457   : > { %v339_v21 = vpop.f32.mrb[4].mxu0 }
 0x458   : > { %v345_v23 = vmul.f32 %v759_v20, %v339_v21  ;;  %v699_v24 = vpop.f32.mrb[5].mxu0 }
 0x459   : > { %v342_v0 = vpop.f32.mrb[6].mxu0 }
 0x45a   : > { %571 = vrot.lane.b32.xlu0 %v345_v23, %s787_s23  ;;  %v700_v26 = vpop.f32.mrb[7].mxu0 }
 0x45f   : > { %v451_v28 = vpop.f32.mrb[8].mxu0 }
 0x460   : > { %v457_v29 = vmul.f32 %v761_v27, %v451_v28  ;;  %v711_v30 = vpop.f32.mrb[9].mxu0 }
 0x461   : > { %v454_v22 = vpop.f32.mrb[10].mxu0 }
 0x462   : > { %575 = vrot.lane.b32.xlu1 %v457_v29, %s788_s24  ;;  %v712_v31 = vpop.f32.mrb[11].mxu0 }
 0x467   : > { %v563_v34 = vpop.f32.mrb[12].mxu0 }
 0x468   : > { %v569_v35 = vmul.f32 %v763_v32, %v563_v34  ;;  %v723_v36 = vpop.f32.mrb[13].mxu0 }
 0x469   : > { %v566_v37 = vpop.f32.mrb[14].mxu0 }
 0x46a   : > { %579 = vrot.lane.b32.xlu0 %v569_v35, %s789_s25  ;;  %v724_v38 = vpop.f32.mrb[15].mxu0 }
 0x4cc   : > { %v572_v41 = vpop.permute.xlu0 %571 }
 0x4cd   : > { %v582_v44 = vsel %vm124_vm1, %v233_v42, %v572_v41 }
 0x4d4   : > { %v576_v43 = vpop.permute.xlu1 %575 }
 0x4d5   : > { %v584_v45 = vsel %vm583_vm4, %v582_v44, %v576_v43 }
 0x4dc   : > { %v580_v46 = vpop.permute.xlu0 %579 }
 0x4dd   : > { %v586_v47 = vsel %vm585_vm5, %v584_v45, %v580_v46 }
 0x4de   : > { %v587_v48 = vpack.c.bf16 %v586_v47, %v586_v47 }
 0x4e0   : > { %589 = vst.msk [vmem:[%s111_s28] sm:$0xf] %vm588_vm6, %v587_v48 }
 0x4e1 PF: > { %s11_s6 = sadd.s32 1, %s772_s6  }
 0x4e2   : > { %p8_p4 = scmp.ge.s32.totalorder %s11_s6, 4  }
 0x4e4   :  { %10 = sbr.rel (!%p8_p4) target bundleno = 1 (0x1), region = 54 }

// kernel: pfa_forward.27
= control target key start
LH: loop header
LB: loop body
LE: loop exit
PB: predicated region body
PF: predicated region fallthrough
CT: control target
= control target key end

     0   :  { %v124_v0 = vmov 0.0   ;;  %vm125_vm0 = vmmov 0   ;;  %vm48_vm1 = vcmask 261120   ;;  %s178_s1 = inlined_call_operand.vmem [shape: bf16[32,32], index: 1, kind: input, shape index: {}]   ;;  %s179_s0 = inlined_call_operand.vmem [shape: bf16[16,32], index: 0, kind: input, shape index: {}]   ;;  %s180_s2 = inlined_call_operand.vmem [shape: f32[1,32], index: 2, kind: input, shape index: {}]   ;;  %s181_s3 = inlined_call_operand.vmem [shape: f32[16,32], index: 3, kind: input, shape index: {}]   ;;  %s182_s4 = inlined_call_operand.vmem [shape: f32[16,32], index: 4, kind: output, shape index: {}]  }
   0x1   :  { %111 = vmatprep.subr.bf16.mxu0 %v124_v0  ;;  %v121_v1 = vld [vmem:[%s178_s1] sm:$0xff]   ;;  %115 = vmatprep.mubr.msk.bf16.mxu0 %vm125_vm0, %v124_v0  ;;  %v122_v2 = vld [vmem:[%s178_s1 + $0x8] sm:$0xff]  }
   0x2   :  { %112 = vmatpush3.bf16.msra.mxu0 %v121_v1  ;;  %v123_v3 = vld [vmem:[%s179_s0] sm:$0xff]   ;;  %v94_v10 = vld [vmem:[%s181_s3 + $0x8] sm:$0xff] }
   0x3   :  { %113 = vmatprep.subr.bf16.mxu0 %v124_v0  ;;  %v103_v4 = vld [vmem:[%s180_s2] ss:$0 sm:$0xff] }
   0x4   :  { %v93_v6 = vld [vmem:[%s181_s3] sm:$0xff] }
   0x6   :  { %114 = vmatpush3.bf16.msra.mxu0 %v122_v2 }
   0x9   :  { %116 = vmatmul.mubr.msk.bf16.vlgmr.msra.gmra.mrb[0].mxu0 %vm48_vm1, %v123_v3 }
  0xdc   :  { %v86_v5 = vpop.f32.mrb[0].mxu0 }
  0xdd   :  { %v87_v7 = vadd.f32 %v103_v4, %v86_v5  ;;  %v117_v8 = vpop.f32.mrb[1].mxu0 }
  0xde   :  { %v89_v9 = vpop.f32.mrb[2].mxu0 }
  0xdf   :  { %v95_v11 = vadd.f32 %v93_v6, %v87_v7  ;;  %v90_v12 = vadd.f32 %v103_v4, %v89_v9  ;;  %v118_v13 = vpop.f32.mrb[3].mxu0 }
  0xe1   :  { %97 = vst.msk [vmem:[%s182_s4] sm:$0xff] %vm48_vm1, %v95_v11  ;;  %v96_v14 = vadd.f32 %v94_v10, %v90_v12 }
  0xe3   :  { %98 = vst.msk [vmem:[%s182_s4 + $0x8] sm:$0xff] %vm48_vm1, %v96_v14 }

// kernel: pfa_forward.28
= control target key start
LH: loop header
LB: loop body
LE: loop exit
PB: predicated region body
PF: predicated region fallthrough
CT: control target
= control target key end

     0   :  { %vm35_vm0 = vcmask 261120   ;;  %v381_v15 = vmov 0.0   ;;  %vm382_vm1 = vmmov 0   ;;  %s499_s0 = inlined_call_operand.vmem [shape: f32[16,32], index: 0, kind: input, shape index: {}]   ;;  %s500_s3 = inlined_call_operand.vmem [shape: bf16[32,128], index: 3, kind: input, shape index: {}]   ;;  %s501_s1 = inlined_call_operand.vmem [shape: f32[1,32], index: 1, kind: input, shape index: {}]   ;;  %s502_s2 = inlined_call_operand.vmem [shape: f32[1,32], index: 2, kind: input, shape index: {}]   ;;  %s503_s5 = inlined_call_operand.vmem [shape: bf16[128,32], index: 5, kind: input, shape index: {}]   ;;  %s504_s4 = inlined_call_operand.vmem [shape: f32[1,128], index: 4, kind: input, shape index: {}]   ;;  %s505_s6 = inlined_call_operand.vmem [shape: f32[1,32], index: 6, kind: input, shape index: {}]   ;;  %s506_s7 = inlined_call_operand.vmem [shape: f32[16,32], index: 7, kind: output, shape index: {}]  }
   0x1   :  { %v426_v0 = vld [vmem:[%s499_s0] sm:$0xff]  ;;  %v431_v1 = vld [vmem:[%s499_s0 + $0x8] sm:$0xff]  ;;  %333 = vmatprep.subr.bf16.mxu0 %v381_v15  ;;  %81 = vst.msk [vmem:[#allocation2] sm:$0xff] %vm35_vm0, %v381_v15  ;;  %82 = vst.msk [vmem:[#allocation2 + $0x8] sm:$0xff] %vm35_vm0, %v381_v15  ;;  %341 = vmatprep.subr.bf16.mxu1 %v381_v15 }
   0x2   :  { %v36_v2 = vsel %vm35_vm0, %v426_v0, 0.0  ;;  %v39_v3 = vsel %vm35_vm0, %v431_v1, 0.0  ;;  %v363_v14 = vld [vmem:[%s500_s3] sm:$0xff]   ;;  %v364_v16 = vld [vmem:[%s500_s3 + $0x8] sm:$0xff]   ;;  %337 = vmatprep.mubr.msk.bf16.mxu0 %vm382_vm1, %v381_v15  ;;  %357 = vmatprep.mubr.msk.bf16.mxu1 %vm382_vm1, %v381_v15  ;;  %v367_v37 = vld [vmem:[%s503_s5 + $0x10] sm:$0xff]  }
   0x3   :  { %37 = vadd.xlane.f32.xlu0 %v36_v2  ;;  %334 = vmatpush3.bf16.msra.mxu0 %v363_v14  ;;  %v306_v25 = vld [vmem:[%s501_s1] ss:$0 sm:$0xff]  ;;  %v366_v36 = vld [vmem:[%s503_s5 + $0x8] sm:$0xff]   ;;  %v368_v38 = vld [vmem:[%s503_s5 + $0x18] sm:$0xff]  }
   0x4   :  { %335 = vmatprep.subr.bf16.mxu0 %v381_v15  ;;  %v307_v29 = vld [vmem:[%s502_s2] ss:$0 sm:$0xff]  ;;  %v370_v40 = vld [vmem:[%s503_s5 + $0x28] sm:$0xff]   ;;  %v371_v41 = vld [vmem:[%s503_s5 + $0x30] sm:$0xff]  }
   0x5   :  { %v365_v35 = vld [vmem:[%s503_s5] sm:$0xff]   ;;  %v372_v42 = vld [vmem:[%s503_s5 + $0x38] sm:$0xff]  }
   0x6   :  { %342 = vmatpush3.bf16.msra.mxu1 %v365_v35  ;;  %v369_v39 = vld [vmem:[%s503_s5 + $0x20] sm:$0xff]  }
   0x7   :  { %40 = vadd.xlane.f32.xlu0 %v39_v3  ;;  %336 = vmatpush3.bf16.msra.mxu0 %v364_v16  ;;  %v308_v43 = vld [vmem:[%s504_s4] ss:$0 sm:$0xff] }
   0x8   :  { %343 = vmatprep.subr.bf16.mxu1 %v381_v15 }
   0xa   :  { %344 = vmatpush3.bf16.msra.mxu1 %v366_v36 }
   0xb   :  { %345 = vmatprep.subr.bf16.mxu1 %v381_v15 }
   0xe   :  { %346 = vmatpush3.bf16.msra.mxu1 %v367_v37 }
   0xf   :  { %347 = vmatprep.subr.bf16.mxu1 %v381_v15 }
  0x12   :  { %348 = vmatpush3.bf16.msra.mxu1 %v368_v38 }
  0x13   :  { %349 = vmatprep.subr.bf16.mxu1 %v381_v15 }
  0x16   :  { %350 = vmatpush3.bf16.msra.mxu1 %v369_v39 }
  0x17   :  { %351 = vmatprep.subr.bf16.mxu1 %v381_v15 }
  0x1a   :  { %352 = vmatpush3.bf16.msra.mxu1 %v370_v40 }
  0x1b   :  { %353 = vmatprep.subr.bf16.mxu1 %v381_v15 }
  0x1e   :  { %354 = vmatpush3.bf16.msra.mxu1 %v371_v41 }
  0x1f   :  { %355 = vmatprep.subr.bf16.mxu1 %v381_v15  ;;  %v320_v15 = vld [vmem:[%s505_s6] ss:$0 sm:$0xff] }
  0x22   :  { %356 = vmatpush3.bf16.msra.mxu1 %v372_v42 }
  0x90   :  { %v38_v4 = vpop.xlane.xlu0 %37 }
  0x91   :  { %v43_v5 = vmul.f32 0.03125, %v38_v4 }
  0x93   :  { %v45_v6 = vsub.f32 %v426_v0, %v43_v5 }
  0x94   :  { %v41_v7 = vpop.xlane.xlu0 %40 }
  0x95   :  { %v44_v8 = vmul.f32 0.03125, %v41_v7  ;;  %v47_v9 = vmul.f32 %v45_v6, %v45_v6  ;;  %v170_v7 = vld [vmem:[#allocation2] sm:$0xff] }
  0x97   :  { %v46_v10 = vsub.f32 %v431_v1, %v44_v8  ;;  %v49_v11 = vsel %vm35_vm0, %v47_v9, 0.0  ;;  %v171_v9 = vld [vmem:[#allocation2 + $0x8] sm:$0xff] }
  0x98   :  { %50 = vadd.xlane.f32.xlu1 %v49_v11 }
  0x99   :  { %v48_v12 = vmul.f32 %v46_v10, %v46_v10 }
  0x9b   :  { %v52_v13 = vsel %vm35_vm0, %v48_v12, 0.0 }
  0x9c   :  { %53 = vadd.xlane.f32.xlu1 %v52_v13 }
 0x125   :  { %v51_v17 = vpop.xlane.xlu1 %50 }
 0x126   :  { %v55_v18 = vmul.f32 0.03125, %v51_v17 }
 0x128   :  { %v57_v19 = vadd.f32 1e-05, %v55_v18 }
 0x129   :  { %v54_v20 = vpop.xlane.xlu1 %53 }
 0x12a   :  { %373 = vrsqrt.f32 %v57_v19  ;;  %v56_v21 = vmul.f32 0.03125, %v54_v20 }
 0x12c   :  { %v58_v22 = vadd.f32 1e-05, %v56_v21 }
 0x12e   :  { %375 = vrsqrt.f32 %v58_v22 }
 0x134   :  { %v374_v23 = vpop.eup %373 }
 0x135   :  { %v61_v24 = vmul.f32 %v374_v23, %v45_v6 }
 0x137   :  { %v69_v27 = vmul.f32 %v306_v25, %v61_v24 }
 0x138   :  { %v376_v26 = vpop.eup %375 }
 0x139   :  { %v62_v28 = vmul.f32 %v376_v26, %v46_v10  ;;  %v77_v31 = vadd.f32 %v307_v29, %v69_v27 }
 0x13b   :  { %v70_v30 = vmul.f32 %v306_v25, %v62_v28 }
 0x13d   :  { %v78_v32 = vadd.f32 %v307_v29, %v70_v30 }
 0x13f   :  { %v79_v33 = vpack.c.bf16 %v78_v32, %v77_v31 }
 0x141   :  { %80 = vst.msk [vmem:[#allocation3] sm:$0xff] %vm35_vm0, %v79_v33 }
 0x148   :  { %v83_v34 = vld [vmem:[#allocation3] sm:$0xff] }
 0x149   :  { %338 = vmatmul.mubr.msk.bf16.vlgmr.msra.gmra.mrb[0].mxu0 %vm35_vm0, %v83_v34 }
 0x21c   :  { %v145_v44 = vpop.f32.mrb[0].mxu0 }
 0x21d   :  { %v146_v45 = vadd.f32 %v308_v43, %v145_v44  ;;  %v339_v46 = vpop.f32.mrb[1].mxu0 }
 0x21e   :  { %v148_v47 = vpop.f32.mrb[2].mxu0 }
 0x21f   :  { %v154_v48 = vmul.f32 0.044715, %v146_v45  ;;  %v149_v49 = vadd.f32 %v308_v43, %v148_v47  ;;  %v340_v50 = vpop.f32.mrb[3].mxu0  ;;  %v152_v63 = vmul.f32 0.5, %v146_v45 }
 0x221   :  { %v156_v51 = vmul.f32 %v154_v48, %v146_v45  ;;  %v155_v52 = vmul.f32 0.044715, %v149_v49  ;;  %v153_v2 = vmul.f32 0.5, %v149_v49 }
 0x223   :  { %v158_v53 = vmul.f32 %v156_v51, %v146_v45  ;;  %v157_v54 = vmul.f32 %v155_v52, %v149_v49 }
 0x225   :  { %v159_v55 = vmul.f32 %v157_v54, %v149_v49  ;;  %v160_v56 = vadd.f32 %v158_v53, %v146_v45 }
 0x227   :  { %v161_v57 = vadd.f32 %v159_v55, %v149_v49  ;;  %v162_v58 = vmul.f32 0.7978846, %v160_v56 }
 0x229   :  { %v163_v59 = vmul.f32 0.7978846, %v161_v57  ;;  %377 = vtanh.f32 %v162_v58 }
 0x22b   :  { %379 = vtanh.f32 %v163_v59 }
 0x233   :  { %v378_v60 = vpop.eup %377 }
 0x234   :  { %v166_v61 = vadd.f32 1.0, %v378_v60 }
 0x235   :  { %v380_v62 = vpop.eup %379 }
 0x236   :  { %v167_v3 = vadd.f32 1.0, %v380_v62  ;;  %v168_v4 = vmul.f32 %v166_v61, %v152_v63 }
 0x238   :  { %v169_v5 = vmul.f32 %v167_v3, %v153_v2 }
 0x23a   :  { %v172_v6 = vpack.c.bf16 %v169_v5, %v168_v4 }
 0x23c   :  { %358 = vmatmul.mubr.bf16.vlgmr.msra.gmra.mrb[0].mxu1 %v172_v6 }
 0x30f   :  { %v271_v8 = vpop.f32.mrb[0].mxu1 }
 0x310   :  { %v278_v10 = vadd.f32 %v271_v8, %v170_v7  ;;  %v359_v11 = vpop.f32.mrb[1].mxu1 }
 0x311   :  { %v274_v12 = vpop.f32.mrb[2].mxu1 }
 0x312   :  { %280 = vst.msk [vmem:[#allocation2] sm:$0xff] %vm35_vm0, %v278_v10  ;;  %v279_v13 = vadd.f32 %v274_v12, %v171_v9  ;;  %v360_v14 = vpop.f32.mrb[3].mxu1 }
 0x314   :  { %281 = vst.msk [vmem:[#allocation2 + $0x8] sm:$0xff] %vm35_vm0, %v279_v13 }
 0x319   :  { %v285_v16 = vld [vmem:[#allocation2] sm:$0xff] }
 0x31a   :  { %v294_v17 = vadd.f32 %v320_v15, %v285_v16 }
 0x31b   :  { %v286_v18 = vld [vmem:[#allocation2 + $0x8] sm:$0xff] }
 0x31c   :  { %v298_v19 = vadd.f32 %v294_v17, %v426_v0  ;;  %v295_v20 = vadd.f32 %v320_v15, %v286_v18 }
 0x31e   :  { %300 = vst.msk [vmem:[%s506_s7] sm:$0xff] %vm35_vm0, %v298_v19  ;;  %v299_v21 = vadd.f32 %v431_v1, %v295_v20 }
 0x320   :  { %301 = vst.msk [vmem:[%s506_s7 + $0x8] sm:$0xff] %vm35_vm0, %v299_v21 }

// kernel: pfa_forward.49
= control target key start
LH: loop header
LB: loop body
LE: loop exit
PB: predicated region body
PF: predicated region fallthrough
CT: control target
= control target key end

     0   :  { %vm19_vm0 = vcmask 261120   ;;  %s167_s0 = inlined_call_operand.vmem [shape: f32[16,32], index: 0, kind: input, shape index: {}]   ;;  %s168_s1 = inlined_call_operand.vmem [shape: f32[1,32], index: 1, kind: input, shape index: {}]   ;;  %s169_s2 = inlined_call_operand.vmem [shape: f32[1,32], index: 2, kind: input, shape index: {}]   ;;  %s170_s3 = inlined_call_operand.hbm [shape: f32[16,32], index: 3, kind: output, shape index: {}]  }
   0x1   :  { %v15_v0 = vld [vmem:[%s167_s0] sm:$0xff]  ;;  %v16_v1 = vld [vmem:[%s167_s0 + $0x8] sm:$0xff] }
   0x2   :  { %8 = vsyncpa [#allocation3], 0  ;;  %v20_v2 = vsel %vm19_vm0, %v15_v0, 0.0  ;;  %v23_v3 = vsel %vm19_vm0, %v16_v1, 0.0  ;;  %v81_v21 = vld [vmem:[%s168_s1] ss:$0 sm:$0xff] }
   0x3   :  { %21 = vadd.xlane.f32.xlu0 %v20_v2  ;;  %v82_v23 = vld [vmem:[%s169_s2] ss:$0 sm:$0xff]  ;;  %s114_s19 = smov [#allocation2]  }
   0x4   :  { %s70_s20 = sshll.u32 %s114_s19, 4  ;;  %s71_s20 = int_to_ptr.vmem [resolvable:$true] %s70_s20 }
   0x5   :  { %s90_s21 = scalar_lea.vmem %s71_s20, 256  ;;  %p95_p1 = scmp.lt.s32.totalorder %s71_s20, %s71_s20 }
   0x6   :  { %p91_p0 = scmp.ne.s32.totalorder %s71_s20, %s90_s21  ;;  %p96_p2 = scmp.lt.s32.totalorder %s90_s21, %s90_s21 }
   0x7   :  { %24 = vadd.xlane.f32.xlu0 %v23_v3 }
   0x8   :  { %p97_p3 = por %p96_p2, %p95_p1 }
   0xa   :  { %p98_p4 = pnand %p97_p3, %p91_p0 }
  0x90   :  { %v22_v4 = vpop.xlane.xlu0 %21 }
  0x91   :  { %v27_v5 = vmul.f32 0.03125, %v22_v4 }
  0x93   :  { %v29_v6 = vsub.f32 %v15_v0, %v27_v5 }
  0x94   :  { %v25_v7 = vpop.xlane.xlu0 %24 }
  0x95   :  { %v28_v8 = vmul.f32 0.03125, %v25_v7  ;;  %v31_v9 = vmul.f32 %v29_v6, %v29_v6 }
  0x97   :  { %v30_v10 = vsub.f32 %v16_v1, %v28_v8  ;;  %v33_v11 = vsel %vm19_vm0, %v31_v9, 0.0 }
  0x98   :  { %34 = vadd.xlane.f32.xlu1 %v33_v11 }
  0x99   :  { %v32_v12 = vmul.f32 %v30_v10, %v30_v10 }
  0x9b   :  { %v36_v13 = vsel %vm19_vm0, %v32_v12, 0.0 }
  0x9c   :  { %37 = vadd.xlane.f32.xlu1 %v36_v13 }
 0x125   :  { %v35_v14 = vpop.xlane.xlu1 %34 }
 0x126   :  { %v39_v15 = vmul.f32 0.03125, %v35_v14 }
 0x128   :  { %v41_v16 = vadd.f32 1e-05, %v39_v15 }
 0x129   :  { %v38_v17 = vpop.xlane.xlu1 %37 }
 0x12a   :  { %86 = vrsqrt.f32 %v41_v16  ;;  %v40_v18 = vmul.f32 0.03125, %v38_v17 }
 0x12c   :  { %v42_v19 = vadd.f32 1e-05, %v40_v18 }
 0x12e   :  { %88 = vrsqrt.f32 %v42_v19 }
 0x134   :  { %v87_v20 = vpop.eup %86 }
 0x135   :  { %v45_v22 = vmul.f32 %v87_v20, %v29_v6 }
 0x137   :  { %v53_v24 = vmul.f32 %v81_v21, %v45_v22 }
 0x138   :  { %v89_v25 = vpop.eup %88 }
 0x139   :  { %v46_v26 = vmul.f32 %v89_v25, %v30_v10  ;;  %v61_v27 = vadd.f32 %v82_v23, %v53_v24 }
 0x13b   :  { %v54_v28 = vmul.f32 %v81_v21, %v46_v26  ;;  %63 = vst.msk [vmem:[#allocation2] sm:$0xff] %vm19_vm0, %v61_v27 }
 0x13d   :  { %v62_v29 = vadd.f32 %v82_v23, %v54_v28 }
 0x13f   :  { %64 = vst.msk [vmem:[#allocation2 + $0x8] sm:$0xff] %vm19_vm0, %v62_v29 }
 0x140   :  { %101 = shalt.err (!%p98_p4)
}
 0x141   :  { %s102_s22 = scalar_lea.hbm %s170_s3, 256 }
 0x142   :  { %p103_p5 = scmp.ne.s32.totalorder %s170_s3, %s102_s22  ;;  %p106_p6 = scmp.lt.u32.totalorder %s102_s22, %s170_s3 }
 0x144   :  { %p108_p7 = pnand %p106_p6, %p103_p5 }
 0x146   :  { %111 = shalt.err (!%p108_p7)
}
 0x147   :  { %s115_s27 = smov 128   ;;  %s116_s28 = smov 8  }
 0x148   :  { %76 = dma.vmem_to_hbm [thread:$0]  %s71_s20, 256, %s170_s3, [#allocation3], %s115_s27, %s115_s27, %s116_s28  }
 0x149   :  { %112 = dma.done.wait [#allocation3], 256  }
 0x14a   :  { %113 = vsyncadd [#allocation3], 4294967040 }
 0x14b   :  { %80 = vsyncpa [#allocation3], 1 }

</bundles_post_ra>
